<compile_context>
chip_gen: v6e
topology: v6e:2x2x1
jax: 0.10.0
libtpu: 0.0.40
codegen_flags: <defaults>
</compile_context>

<pallas_src>
import functools

import jax
import jax.numpy as jnp
from jax.experimental import pallas as pl
from jax.experimental.pallas import tpu as pltpu

# ----------------------------- model dims -----------------------------------
NUM_INPUT = 256      # num_input  (lane-aligned, small example size)
NUM_OUTPUT = 64      # num_output
LANE = 128           # TPU lane width — narrow layers are zero-padded to this

# Layer dims implied by the module's __init__ (hs = [1024, 512, 128, 32]):
L1_IN, L1_OUT = NUM_INPUT, 512
L2_IN, L2_OUT = 512, 128
L3_IN, L3_OUT = 128, 32
LO_IN, LO_OUT = 32, NUM_OUTPUT

BATCH = 512          # candidate-action batch (exercises a multi-step grid)
BLOCK_M = 256        # rows per grid step: fills v6e/v7x MXU M dim; use 128 on v5e


# ------------------------------ kernel ---------------------------------------
def moldqn_kernel(x_ref,
                  w1_ref, b1_ref,
                  w2_ref, b2_ref,
                  w3_ref, b3_ref,
                  wo_ref, bo_ref,
                  o_ref):
    # In-kernel bf16 cast of the f32 input tile (VPU has slack; avoids a
    # separate wrapper-side XLA cast + HBM round trip).
    x = x_ref[...].astype(jnp.bfloat16)

    # 4 chained bf16 MXU matmuls with f32 accumulation; bias + ReLU on VPU in
    # f32; activations cast back to bf16 for the next MXU push.
    h = jnp.dot(x, w1_ref[...], preferred_element_type=jnp.float32)
    h = jnp.maximum(h + b1_ref[...], 0.0)

    h = jnp.dot(h.astype(jnp.bfloat16), w2_ref[...],
                preferred_element_type=jnp.float32)
    h = jnp.maximum(h + b2_ref[...], 0.0)

    # L3 is zero-padded 32 -> 128 output lanes (padded cols stay exactly 0
    # after relu(0 + 0)), so every vreg downstream is lane-dense.
    h = jnp.dot(h.astype(jnp.bfloat16), w3_ref[...],
                preferred_element_type=jnp.float32)
    h = jnp.maximum(h + b3_ref[...], 0.0)

    # Output layer: rows zero-padded 32 -> 128 to match the padded activation;
    # real NUM_OUTPUT columns are emitted directly (no wrapper slice needed).
    out = jnp.dot(h.astype(jnp.bfloat16), wo_ref[...],
                  preferred_element_type=jnp.float32)
    o_ref[...] = (out + bo_ref[...]).astype(o_ref.dtype)


# ------------------------------ wrapper ---------------------------------------
@functools.partial(jax.jit, static_argnames=("block_m",))
def moldqn_forward(x, packed_params, *, block_m=BLOCK_M):
    """x: (B, NUM_INPUT) f32; packed_params from pack_params()."""
    w1, b1, w2, b2, w3, b3, wo, bo = packed_params
    B = x.shape[0]

    # Pick the row tile; pad the batch up to a tile multiple (padded rows are
    # zeros and are sliced off after the call — only happens for ragged B).
    bm = block_m if B >= block_m else B
    pad = (-B) % bm
    if pad:
        x = jnp.pad(x, ((0, pad), (0, 0)))
    bp = B + pad
    grid = (bp // bm,)

    # Weights/biases: constant index_map -> DMA'd once, VMEM-resident for the
    # whole grid (total < 0.5 MiB, trivially within VMEM on v5e/v6e/v7x).
    def resident(shape):
        return pl.BlockSpec(shape, lambda i: (0, 0))

    layer_mults = (L1_IN * L1_OUT + L2_IN * L2_OUT + L3_IN * LANE
                   + LANE * LO_OUT)
    cost = pl.CostEstimate(
        flops=2 * bp * layer_mults,
        transcendentals=0,
        bytes_accessed=(bp * NUM_INPUT * 4            # x (f32 in)
                        + layer_mults * 2             # bf16 weights
                        + (L1_OUT + L2_OUT + LANE + LO_OUT) * 4  # f32 biases
                        + bp * NUM_OUTPUT * 4),       # f32 out
    )

    out = pl.pallas_call(
        moldqn_kernel,
        out_shape=jax.ShapeDtypeStruct((bp, NUM_OUTPUT), jnp.float32),
        grid=grid,
        in_specs=[
            pl.BlockSpec((bm, NUM_INPUT), lambda i: (i, 0)),   # x: tiled over rows
            resident((L1_IN, L1_OUT)), resident((1, L1_OUT)),
            resident((L2_IN, L2_OUT)), resident((1, L2_OUT)),
            resident((L3_IN, LANE)),   resident((1, LANE)),
            resident((LANE, LO_OUT)),  resident((1, LO_OUT)),
        ],
        out_specs=pl.BlockSpec((bm, NUM_OUTPUT), lambda i: (i, 0)),
        compiler_params=pltpu.CompilerParams(
            # Batch axis is embarrassingly parallel -> shards across the two
            # TensorCores on v7x; harmless no-op on v5e/v6e.
            dimension_semantics=("parallel",)),
        cost_estimate=cost,
    )(x, w1, b1, w2, b2, w3, b3, wo, bo)

    if pad:
        out = out[:B]
    return out


# ------------------------- deterministic init ---------------------------------
def init_linear(key, fan_in, fan_out):
    # Matches torch.nn.Linear default: U(-1/sqrt(fan_in), 1/sqrt(fan_in)).
    kw, kb = jax.random.split(key)
    bound = 1.0 / jnp.sqrt(jnp.float32(fan_in))
    w = jax.random.uniform(kw, (fan_in, fan_out), jnp.float32, -bound, bound)
    b = jax.random.uniform(kb, (1, fan_out), jnp.float32, -bound, bound)
    return w, b


def init_params(key):
    k1, k2, k3, ko = jax.random.split(key, 4)
    return (
        init_linear(k1, L1_IN, L1_OUT),
        init_linear(k2, L2_IN, L2_OUT),
        init_linear(k3, L3_IN, L3_OUT),
        init_linear(ko, LO_IN, LO_OUT),
    )


def pack_params(params):
    """Cast weights to bf16, keep biases f32, zero-pad the narrow L3/out layers."""
    (w1, b1), (w2, b2), (w3, b3), (wo, bo) = params

    # L3: pad output 32 -> 128 lanes. Out layer: pad input rows 32 -> 128 to
    # match the padded activation (padded activation lanes are exactly 0, so
    # the extra zero rows contribute nothing); keep the real 64 output cols.
    w3p = jnp.zeros((L3_IN, LANE), jnp.float32).at[:, :L3_OUT].set(w3)
    b3p = jnp.zeros((1, LANE), jnp.float32).at[:, :L3_OUT].set(b3)
    wop = jnp.zeros((LANE, LO_OUT), jnp.float32).at[:LO_IN, :].set(wo)

    return (
        w1.astype(jnp.bfloat16), b1,
        w2.astype(jnp.bfloat16), b2,
        w3p.astype(jnp.bfloat16), b3p,
        wop.astype(jnp.bfloat16), bo,
    )


def reference_forward(x, params):
    # Pure-f32 reference with the original (unpadded) parameters.
    (w1, b1), (w2, b2), (w3, b3), (wo, bo) = params
    h = jnp.maximum(x @ w1 + b1, 0.0)
    h = jnp.maximum(h @ w2 + b2, 0.0)
    h = jnp.maximum(h @ w3 + b3, 0.0)
    return h @ wo + bo


if __name__ == "__main__":
    key = jax.random.PRNGKey(0)
    kx, kp = jax.random.split(key)

    x = jax.random.normal(kx, (BATCH, NUM_INPUT), jnp.float32)
    params = init_params(kp)
    packed = pack_params(params)

    out = jax.block_until_ready(moldqn_forward(x, packed))

    ref = reference_forward(x, params)
    assert out.shape == (BATCH, NUM_OUTPUT)
    # bf16 operands (f32 accumulation) vs. pure-f32 reference -> loosened tol.
    assert jnp.allclose(out, ref, atol=5e-2, rtol=5e-2), "mismatch vs JAX reference"

    # TODO(synk): optional v7x-only fp8 weight quantization (per-tensor scale
    # applied post-accumulation) if DQN Q-value accuracy tolerates it.
    print("KERNEL_OK")
</pallas_src>

<mosaic_0001>
module attributes {stable_mosaic.version = 11 : i64} {
  func.func @moldqn_kernel(%arg0: i32, %arg1: memref<256x256xf32, #tpu.memory_space<vmem>>, %arg2: memref<256x512xbf16, #tpu.memory_space<vmem>>, %arg3: memref<1x512xf32, #tpu.memory_space<vmem>>, %arg4: memref<512x128xbf16, #tpu.memory_space<vmem>>, %arg5: memref<1x128xf32, #tpu.memory_space<vmem>>, %arg6: memref<128x128xbf16, #tpu.memory_space<vmem>>, %arg7: memref<1x128xf32, #tpu.memory_space<vmem>>, %arg8: memref<128x64xbf16, #tpu.memory_space<vmem>>, %arg9: memref<1x64xf32, #tpu.memory_space<vmem>>, %arg10: memref<256x64xf32, #tpu.memory_space<vmem>>) attributes {dimension_semantics = [#tpu.dimension_semantics<parallel>], iteration_bounds = array<i64: 2>, scalar_prefetch = 0 : i64, scratch_operands = 0 : i64, tpu.core_type = #tpu.core_type<tc>, window_params = [{transform_indices = @transform_0, window_bounds = array<i64: 256, 256>}, {pipeline_mode = #tpu.pipeline_mode<synchronous>, transform_indices = @transform_1, window_bounds = array<i64: 256, 512>}, {pipeline_mode = #tpu.pipeline_mode<synchronous>, transform_indices = @transform_2, window_bounds = array<i64: 1, 512>}, {pipeline_mode = #tpu.pipeline_mode<synchronous>, transform_indices = @transform_3, window_bounds = array<i64: 512, 128>}, {pipeline_mode = #tpu.pipeline_mode<synchronous>, transform_indices = @transform_4, window_bounds = array<i64: 1, 128>}, {pipeline_mode = #tpu.pipeline_mode<synchronous>, transform_indices = @transform_5, window_bounds = array<i64: 128, 128>}, {pipeline_mode = #tpu.pipeline_mode<synchronous>, transform_indices = @transform_6, window_bounds = array<i64: 1, 128>}, {pipeline_mode = #tpu.pipeline_mode<synchronous>, transform_indices = @transform_7, window_bounds = array<i64: 128, 64>}, {pipeline_mode = #tpu.pipeline_mode<synchronous>, transform_indices = @transform_8, window_bounds = array<i64: 1, 64>}, {transform_indices = @transform_9, window_bounds = array<i64: 256, 64>}]} {
    %c0 = arith.constant 0 : index
    %c0_0 = arith.constant 0 : index
    %0 = vector.load %arg1[%c0, %c0_0] : memref<256x256xf32, #tpu.memory_space<vmem>>, vector<256x256xf32>
    %1 = arith.truncf %0 : vector<256x256xf32> to vector<256x256xbf16>
    %c0_1 = arith.constant 0 : index
    %c0_2 = arith.constant 0 : index
    %2 = vector.load %arg2[%c0_1, %c0_2] : memref<256x512xbf16, #tpu.memory_space<vmem>>, vector<256x512xbf16>
    %cst = arith.constant dense<0.000000e+00> : vector<256x512xf32>
    %3 = tpu.matmul %1, %2, %cst {dimension_numbers = #tpu.dot_dimension_numbers<[1], [0], [0], [1], [0, 0, 1, 1], [], []>} : vector<256x256xbf16>, vector<256x512xbf16>, vector<256x512xf32> -> vector<256x512xf32>
    %c0_3 = arith.constant 0 : index
    %c0_4 = arith.constant 0 : index
    %4 = vector.load %arg3[%c0_3, %c0_4] : memref<1x512xf32, #tpu.memory_space<vmem>>, vector<1x512xf32>
    %5 = vector.broadcast %4 : vector<1x512xf32> to vector<256x512xf32>
    %6 = arith.addf %3, %5 : vector<256x512xf32>
    %cst_5 = arith.constant 0.000000e+00 : f32
    %7 = vector.broadcast %cst_5 : f32 to vector<256x512xf32>
    %8 = arith.maximumf %6, %7 : vector<256x512xf32>
    %9 = arith.truncf %8 : vector<256x512xf32> to vector<256x512xbf16>
    %c0_6 = arith.constant 0 : index
    %c0_7 = arith.constant 0 : index
    %10 = vector.load %arg4[%c0_6, %c0_7] : memref<512x128xbf16, #tpu.memory_space<vmem>>, vector<512x128xbf16>
    %cst_8 = arith.constant dense<0.000000e+00> : vector<256x128xf32>
    %11 = tpu.matmul %9, %10, %cst_8 {dimension_numbers = #tpu.dot_dimension_numbers<[1], [0], [0], [1], [0, 0, 1, 1], [], []>} : vector<256x512xbf16>, vector<512x128xbf16>, vector<256x128xf32> -> vector<256x128xf32>
    %c0_9 = arith.constant 0 : index
    %c0_10 = arith.constant 0 : index
    %12 = vector.load %arg5[%c0_9, %c0_10] : memref<1x128xf32, #tpu.memory_space<vmem>>, vector<1x128xf32>
    %13 = vector.broadcast %12 : vector<1x128xf32> to vector<256x128xf32>
    %14 = arith.addf %11, %13 : vector<256x128xf32>
    %cst_11 = arith.constant 0.000000e+00 : f32
    %15 = vector.broadcast %cst_11 : f32 to vector<256x128xf32>
    %16 = arith.maximumf %14, %15 : vector<256x128xf32>
    %17 = arith.truncf %16 : vector<256x128xf32> to vector<256x128xbf16>
    %c0_12 = arith.constant 0 : index
    %c0_13 = arith.constant 0 : index
    %18 = vector.load %arg6[%c0_12, %c0_13] : memref<128x128xbf16, #tpu.memory_space<vmem>>, vector<128x128xbf16>
    %cst_14 = arith.constant dense<0.000000e+00> : vector<256x128xf32>
    %19 = tpu.matmul %17, %18, %cst_14 {dimension_numbers = #tpu.dot_dimension_numbers<[1], [0], [0], [1], [0, 0, 1, 1], [], []>} : vector<256x128xbf16>, vector<128x128xbf16>, vector<256x128xf32> -> vector<256x128xf32>
    %c0_15 = arith.constant 0 : index
    %c0_16 = arith.constant 0 : index
    %20 = vector.load %arg7[%c0_15, %c0_16] : memref<1x128xf32, #tpu.memory_space<vmem>>, vector<1x128xf32>
    %21 = vector.broadcast %20 : vector<1x128xf32> to vector<256x128xf32>
    %22 = arith.addf %19, %21 : vector<256x128xf32>
    %cst_17 = arith.constant 0.000000e+00 : f32
    %23 = vector.broadcast %cst_17 : f32 to vector<256x128xf32>
    %24 = arith.maximumf %22, %23 : vector<256x128xf32>
    %25 = arith.truncf %24 : vector<256x128xf32> to vector<256x128xbf16>
    %c0_18 = arith.constant 0 : index
    %c0_19 = arith.constant 0 : index
    %26 = vector.load %arg8[%c0_18, %c0_19] : memref<128x64xbf16, #tpu.memory_space<vmem>>, vector<128x64xbf16>
    %cst_20 = arith.constant dense<0.000000e+00> : vector<256x64xf32>
    %27 = tpu.matmul %25, %26, %cst_20 {dimension_numbers = #tpu.dot_dimension_numbers<[1], [0], [0], [1], [0, 0, 1, 1], [], []>} : vector<256x128xbf16>, vector<128x64xbf16>, vector<256x64xf32> -> vector<256x64xf32>
    %c0_21 = arith.constant 0 : index
    %c0_22 = arith.constant 0 : index
    %28 = vector.load %arg9[%c0_21, %c0_22] : memref<1x64xf32, #tpu.memory_space<vmem>>, vector<1x64xf32>
    %29 = vector.broadcast %28 : vector<1x64xf32> to vector<256x64xf32>
    %30 = arith.addf %27, %29 : vector<256x64xf32>
    %c0_23 = arith.constant 0 : index
    %c0_24 = arith.constant 0 : index
    %31 = vector.load %arg10[%c0_23, %c0_24] : memref<256x64xf32, #tpu.memory_space<vmem>>, vector<256x64xf32>
    tpu.vector_store %arg10[%c0_23, %c0_24], %30 {strides = array<i32>} : memref<256x64xf32, #tpu.memory_space<vmem>>, vector<256x64xf32>,
    return
  }
  func.func @transform_0(%arg0: i32) -> (i32, i32) {
    %c0_i32 = arith.constant 0 : i32
    %c0_i32_0 = arith.constant 0 : i32
    return %arg0, %c0_i32 : i32, i32
  }
  func.func @transform_1(%arg0: i32) -> (i32, i32) {
    %c0_i32 = arith.constant 0 : i32
    %c0_i32_0 = arith.constant 0 : i32
    %c0_i32_1 = arith.constant 0 : i32
    return %c0_i32, %c0_i32_0 : i32, i32
  }
  func.func @transform_2(%arg0: i32) -> (i32, i32) {
    %c0_i32 = arith.constant 0 : i32
    %c0_i32_0 = arith.constant 0 : i32
    %c0_i32_1 = arith.constant 0 : i32
    return %c0_i32, %c0_i32_0 : i32, i32
  }
  func.func @transform_3(%arg0: i32) -> (i32, i32) {
    %c0_i32 = arith.constant 0 : i32
    %c0_i32_0 = arith.constant 0 : i32
    %c0_i32_1 = arith.constant 0 : i32
    return %c0_i32, %c0_i32_0 : i32, i32
  }
  func.func @transform_4(%arg0: i32) -> (i32, i32) {
    %c0_i32 = arith.constant 0 : i32
    %c0_i32_0 = arith.constant 0 : i32
    %c0_i32_1 = arith.constant 0 : i32
    return %c0_i32, %c0_i32_0 : i32, i32
  }
  func.func @transform_5(%arg0: i32) -> (i32, i32) {
    %c0_i32 = arith.constant 0 : i32
    %c0_i32_0 = arith.constant 0 : i32
    %c0_i32_1 = arith.constant 0 : i32
    return %c0_i32, %c0_i32_0 : i32, i32
  }
  func.func @transform_6(%arg0: i32) -> (i32, i32) {
    %c0_i32 = arith.constant 0 : i32
    %c0_i32_0 = arith.constant 0 : i32
    %c0_i32_1 = arith.constant 0 : i32
    return %c0_i32, %c0_i32_0 : i32, i32
  }
  func.func @transform_7(%arg0: i32) -> (i32, i32) {
    %c0_i32 = arith.constant 0 : i32
    %c0_i32_0 = arith.constant 0 : i32
    %c0_i32_1 = arith.constant 0 : i32
    return %c0_i32, %c0_i32_0 : i32, i32
  }
  func.func @transform_8(%arg0: i32) -> (i32, i32) {
    %c0_i32 = arith.constant 0 : i32
    %c0_i32_0 = arith.constant 0 : i32
    %c0_i32_1 = arith.constant 0 : i32
    return %c0_i32, %c0_i32_0 : i32, i32
  }
  func.func @transform_9(%arg0: i32) -> (i32, i32) {
    %c0_i32 = arith.constant 0 : i32
    %c0_i32_0 = arith.constant 0 : i32
    return %arg0, %c0_i32 : i32, i32
  }
}

</mosaic_0001>

<bundles_post_ra>
// kernel: moldqn_forward.1
= control target key start
LH: loop header
LB: loop body
LE: loop exit
PB: predicated region body
PF: predicated region fallthrough
CT: control target
= control target key end

     0   :  { %14 = vsyncpa [#allocation3], 0  ;;  %s4194_s0 = inlined_call_operand.hbm [shape: f32[512,256], index: 0, kind: input, shape index: {}]   ;;  %s4195_s1 = inlined_call_operand.hbm [shape: bf16[256,512], index: 1, kind: input, shape index: {}]   ;;  %s4196_s2 = inlined_call_operand.vmem [shape: f32[1,512], index: 2, kind: input, shape index: {}]   ;;  %s4197_s3 = inlined_call_operand.hbm [shape: bf16[512,128], index: 3, kind: input, shape index: {}]   ;;  %s4198_s4 = inlined_call_operand.vmem [shape: f32[1,128], index: 4, kind: input, shape index: {}]   ;;  %s4199_s5 = inlined_call_operand.vmem [shape: bf16[128,128], index: 5, kind: input, shape index: {}]   ;;  %s4200_s6 = inlined_call_operand.vmem [shape: f32[1,128], index: 6, kind: input, shape index: {}]   ;;  %s4201_s7 = inlined_call_operand.vmem [shape: bf16[128,64], index: 7, kind: input, shape index: {}]   ;;  %s4202_s8 = inlined_call_operand.vmem [shape: f32[1,64], index: 8, kind: input, shape index: {}]   ;;  %s4203_s9 = inlined_call_operand.vmem [shape: f32[512,64], index: 9, kind: output, shape index: {}]  }
   0x1   :  { %16 = vsyncpa [#allocation3 + $0x1], 0 }
   0x2   :  { %17 = vsyncpa [#allocation5], 0  ;;  %s3618_s30 = smov 0   ;;  %s3620_s10 = smov 0  }
   0x3   :  { %s3622_s11 = smov 0   ;;  %s3624_s12 = smov 0  }
   0x4 LB: > { %s4204_s13 = sadd.s32 4294967295, %s3559_s12   ;;  %p43_p0 = scmp.ne.s32.totalorder %s3551_s10, %s3547_s30  ;;  %s3559_s12 = sphi %s3624_s12, %s4225_s12   ;;  %s3555_s11 = sphi %s3622_s11, %s4224_s11   ;;  %s3551_s10 = sphi %s3620_s10, %s4223_s10   ;;  %s3547_s30 = sphi %s3618_s30, %s4222_s30  }
   0x5   : > { %p3640_p1 = scmp.eq.s32.totalorder %s4204_s13, 0  ;;  %p2732_p2 = scmp.ge.s32.totalorder %s3559_s12, 1 }
   0x6   : > { %p248_p3 = scmp.lt.s32.totalorder %s3559_s12, 3  ;;  %s3561_s17 = smov [#allocation4]  }
   0x7   : > { %s4211_s14 = scalar_select %p3640_p1, 1, 0 }
   0x8   : > { %p3648_p4 = por %p3640_p1, %p43_p0  ;;  %p3652_p5 = pnand %p2732_p2, %p248_p3 }
   0x9   : > { %s260_s18 = sshll.u32 %s3561_s17, 4  ;;  %s3562_s20 = smov [#allocation6]   ;;  %s261_s18 = int_to_ptr.vmem [resolvable:$true] %s260_s18 }
   0xa   : > { %s4212_s15 = scalar_select %p3648_p4, 1, 0 }
   0xb   : > { %s4213_s16 = scalar_select %p3652_p5, 1, 0 }
   0xc   : > { %p3243_p6 = pneg %p3652_p5  ;;  %s276_s21 = sshll.u32 %s3562_s20, 4  ;;  %s277_s21 = int_to_ptr.vmem [resolvable:$true] %s276_s21 }
   0xd   : > { %s3452_s22 = scalar_lea.vmem %s261_s18, 8192  ;;  %p3460_p12 = scmp.lt.s32.totalorder %s261_s18, %s261_s18 }
   0xe   : > { %p3660_p7 = pnand %p3243_p6, %p3640_p1  ;;  %p3453_p9 = scmp.ne.s32.totalorder %s261_s18, %s3452_s22 }
   0xf   : > { %p3461_p13 = scmp.lt.s32.totalorder %s3452_s22, %s3452_s22 }
  0x10   : > { %p3443_p8 = pneg %p3660_p7 }
  0x11   : > { %p3462_p0 = por %p3461_p13, %p3460_p12 }
  0x12   : > { %p3455_p10 = pnand %p3453_p9, %p3443_p8 }
  0x14   : > { %p3456_p11 = pneg %p3455_p10 }
  0x16   : > { %p3463_p2 = pnand %p3462_p0, %p3456_p11 }
  0x18   : > { %3466 = shalt.err (!%p3463_p2)
}
  0x19   : > { %s4205_s23 = smov 256   ;;  %s4206_s24 = smov 16  }
  0x1a   : > { %3246 = dma.hbm_to_vmem [thread:$0]  (!%p3660_p7), %s4195_s1, 8192, %s261_s18, [#allocation5], %s4205_s23, %s4205_s23, %s4206_s24  }
  0x1b   : > { %s3478_s27 = scalar_lea.vmem %s277_s21, 4096  ;;  %p3486_p10 = scmp.lt.s32.totalorder %s277_s21, %s277_s21 }
  0x1c   : > { %p3479_p3 = scmp.ne.s32.totalorder %s277_s21, %s3478_s27  ;;  %p3487_p11 = scmp.lt.s32.totalorder %s3478_s27, %s3478_s27 }
  0x1e   : > { %p3481_p6 = pnand %p3479_p3, %p3443_p8  ;;  %p3488_p12 = por %p3487_p11, %p3486_p10 }
  0x20   : > { %p3482_p9 = pneg %p3481_p6 }
  0x22   : > { %p3489_p13 = pnand %p3488_p12, %p3482_p9 }
  0x24   : > { %3492 = shalt.err (!%p3489_p13)
}
  0x25   : > { %s3565_s28 = smov 64   ;;  %s3566_s29 = smov 4  }
  0x26   : > { %3249 = dma.hbm_to_vmem [thread:$0]  (!%p3660_p7), %s4197_s3, 4096, %s277_s21, [#allocation5], %s3565_s28, %s3565_s28, %s3566_s29  }
  0x27   : > { %s3686_s18 = sadd.s32 1, %s3559_s12   ;;  %s30_s22 = sadd.s32 1, %s3555_s11 }
  0x28   : > { %s27_s20 = ssub.s32 %s3559_s12, %s3686_s18  ;;  %p37_p0 = scmp.ne.s32.totalorder %s3555_s11, %s3551_s10 }
  0x29   : > { %p28_p8 = scmp.eq.s32.totalorder %s27_s20, 0  ;;  %p38_p2 = scmp.eq.s32.totalorder %s3559_s12, 0 }
  0x2a   : > { %p3256_p6 = scmp.lt.s32.totalorder %s3559_s12, 2  ;;  %s305_s26 = sand.u32 1, %s3555_s11  }
  0x2b   : > { %s3695_s25 = scalar_select %p28_p8, %s3555_s11, %s30_s22  }
  0x2c   : > { %p39_p3 = por %p38_p2, %p37_p0  ;;  %s2864_s27 = sshll.u32 %s3559_s12, 13 }
  0x2d   : > { %s2736_s13 = sshll.u32 %s305_s26, 9  ;;  %s3703_s30 = scalar_lea.hbm %s4194_s0, %s2864_s27 }
  0x2e   : > { %s309_s21 = scalar_lea.vmem [#allocation2], %s2736_s13  ;;  %p3705_p7 = pnand %p3256_p6, %p39_p3 }
  0x2f   : > { %s317_s28 = sshll.u32 %s309_s21, 4  ;;  %s3711_s17 = scalar_lea.sflag [#allocation3], %s305_s26  ;;  %s3709_s28 = int_to_ptr.vmem [resolvable:$true] %s317_s28 }
  0x30   : > { %s3493_s20 = scalar_lea.hbm %s3703_s30, 8192  ;;  %p3495_p10 = pneg %p3705_p7 }
  0x31   : > { %p3494_p9 = scmp.ne.s32.totalorder %s3703_s30, %s3493_s20  ;;  %s3498_s13 = scalar_lea.hbm %s4194_s0, 16384 }
  0x32   : > { %p3499_p13 = scmp.lt.s32.totalorder %s3703_s30, %s4194_s0  ;;  %p3500_p8 = scmp.lt.s32.totalorder %s3498_s13, %s3493_s20 }
  0x33   : > { %p3496_p11 = pnand %p3495_p10, %p3494_p9 }
  0x34   : > { %p3501_p0 = por %p3500_p8, %p3499_p13 }
  0x35   : > { %p3497_p12 = pneg %p3496_p11 }
  0x37   : > { %p3502_p2 = pnand %p3501_p0, %p3497_p12 }
  0x39   : > { %3505 = shalt.err (!%p3502_p2)
}
  0x3a   : > { %s3506_s26 = scalar_lea.vmem %s3709_s28, 8192  ;;  %s3567_s21 = smov [#allocation2]  }
  0x3b   : > { %p3507_p3 = scmp.ne.s32.totalorder %s3709_s28, %s3506_s26  ;;  %s3511_s24 = sshll.u32 %s3567_s21, 4  ;;  %s3512_s24 = int_to_ptr.vmem [resolvable:$false] %s3511_s24 }
  0x3c   : > { %s3513_s23 = scalar_lea.vmem %s3512_s24, 16384  ;;  %p3514_p11 = scmp.lt.s32.totalorder %s3709_s28, %s3512_s24 }
  0x3d   : > { %p3509_p6 = pnand %p3507_p3, %p3495_p10  ;;  %p3515_p1 = scmp.lt.s32.totalorder %s3513_s23, %s3506_s26 }
  0x3f   : > { %p3510_p9 = pneg %p3509_p6  ;;  %p3516_p4 = por %p3515_p1, %p3514_p11 }
  0x41   : > { %p3517_p5 = pnand %p3516_p4, %p3510_p9 }
  0x43   : > { %3520 = shalt.err (!%p3517_p5)
}
  0x44   : > { %s4216_s20 = smov 16   ;;  %s4217_s22 = smov 256  }
  0x45   : > { %3253 = dma.hbm_to_vmem [thread:$0]  (!%p3705_p7), %s3703_s30, 8192, %s3709_s28, %s3711_s17, %s4217_s22, %s4217_s22, %s4216_s20  }
  0x46   : > { %p4218_p10 = scmp.ne.s32.totalorder %s4213_s16, 0 }
  0x47   : > { %s331_s13 = sand.u32 (!%p4218_p10), 1, %s3551_s10   ;;  %p4219_p1 = scmp.ne.s32.totalorder (!%p4218_p10), %s4212_s15, 0 }
  0x48   : > { %329 = sbr.rel (%p4218_p10) target bundleno = 1089 (0x441), region = 56  ;;  %s2741_s24 = sshll.u32 (!%p4218_p10), %s331_s13, 9 }
  0x49   : > { %s332_s27 = scalar_lea.sflag (!%p4218_p10), [#allocation3], %s331_s13  ;;  %s3738_s19 = scalar_lea.vmem (!%p4218_p10), [#allocation2], %s2741_s24 }
  0x4d   : > { %3538 = dma.done.wait (%p4219_p1), %s332_s27, 8192  }
  0x4e   : > { %3540 = vsyncadd (%p4219_p1), %s332_s27, 4294959104  ;;  %p4220_p4 = scmp.ne.s32.totalorder %s4211_s14, 0 }
  0x50   : > { %3542 = dma.done.wait (%p4220_p4), [#allocation5], 12288  }
  0x51   : > { %3544 = vsyncadd (%p4220_p4), [#allocation5], 4294955008  ;;  %v3297_v0 = vld [vmem:[#allocation4 + $0xe4] ss:$16 sps:$4 sm:$0xff]   ;;  %v3299_v1 = vld [vmem:[#allocation4 + $0xec] ss:$16 sps:$4 sm:$0xff]  }
  0x52   : > { %888 = vmatprep.subr.bf16.mxu0 %v3297_v0  ;;  %v3301_v2 = vld [vmem:[#allocation4 + $0xe0] ss:$16 sps:$4 sm:$0xff]   ;;  %v3302_v3 = vld [vmem:[#allocation4 + $0xe8] ss:$16 sps:$4 sm:$0xff]   ;;  %1081 = vmatprep.subr.bf16.mxu1 %v3299_v1  ;;  %v3303_v4 = vld [vmem:[#allocation4 + $0xc4] ss:$16 sps:$4 sm:$0xff]  }
  0x53   : > { %889 = vmatpush1.bf16.msra.mxu0 %v3301_v2  ;;  %1082 = vmatpush1.bf16.msra.mxu1 %v3302_v3  ;;  %v3305_v5 = vld [vmem:[#allocation4 + $0xcc] ss:$16 sps:$4 sm:$0xff]   ;;  %v3307_v6 = vld [vmem:[#allocation4 + $0xc0] ss:$16 sps:$4 sm:$0xff]   ;;  %v3308_v7 = vld [vmem:[#allocation4 + $0xc8] ss:$16 sps:$4 sm:$0xff]  }
  0x54   : > { %890 = vmatprep.subr.bf16.mxu0 %v3303_v4  ;;  %1083 = vmatprep.subr.bf16.mxu1 %v3305_v5  ;;  %v3309_v8 = vld [vmem:[#allocation4 + $0xa4] ss:$16 sps:$4 sm:$0xff]   ;;  %v3311_v9 = vld [vmem:[#allocation4 + $0xac] ss:$16 sps:$4 sm:$0xff]   ;;  %v3313_v10 = vld [vmem:[#allocation4 + $0xa0] ss:$16 sps:$4 sm:$0xff]  }
  0x55   : > { %v3314_v11 = vld [vmem:[#allocation4 + $0xa8] ss:$16 sps:$4 sm:$0xff]   ;;  %v3315_v12 = vld [vmem:[#allocation4 + $0x84] ss:$16 sps:$4 sm:$0xff]   ;;  %v3317_v13 = vld [vmem:[#allocation4 + $0x8c] ss:$16 sps:$4 sm:$0xff]  }
  0x56   : > { %v3319_v14 = vld [vmem:[#allocation4 + $0x80] ss:$16 sps:$4 sm:$0xff]   ;;  %v3320_v15 = vld [vmem:[#allocation4 + $0x88] ss:$16 sps:$4 sm:$0xff]   ;;  %v3321_v16 = vld [vmem:[#allocation4 + $0x64] ss:$16 sps:$4 sm:$0xff]  }
  0x57   : > { %891 = vmatpush1.bf16.msra.mxu0 %v3307_v6  ;;  %1084 = vmatpush1.bf16.msra.mxu1 %v3308_v7  ;;  %v3323_v17 = vld [vmem:[#allocation4 + $0x6c] ss:$16 sps:$4 sm:$0xff]   ;;  %v3325_v18 = vld [vmem:[#allocation4 + $0x60] ss:$16 sps:$4 sm:$0xff]   ;;  %v3326_v19 = vld [vmem:[#allocation4 + $0x68] ss:$16 sps:$4 sm:$0xff]  }
  0x58   : > { %892 = vmatprep.subr.bf16.mxu0 %v3309_v8  ;;  %1085 = vmatprep.subr.bf16.mxu1 %v3311_v9  ;;  %v3327_v20 = vld [vmem:[#allocation4 + $0x44] ss:$16 sps:$4 sm:$0xff]   ;;  %v3329_v21 = vld [vmem:[#allocation4 + $0x4c] ss:$16 sps:$4 sm:$0xff]   ;;  %v3331_v22 = vld [vmem:[#allocation4 + $0x40] ss:$16 sps:$4 sm:$0xff]  }
  0x59   : > { %v3332_v23 = vld [vmem:[#allocation4 + $0x48] ss:$16 sps:$4 sm:$0xff]   ;;  %v3333_v24 = vld [vmem:[#allocation4 + $0x24] ss:$16 sps:$4 sm:$0xff]   ;;  %v3335_v25 = vld [vmem:[#allocation4 + $0x2c] ss:$16 sps:$4 sm:$0xff]  }
  0x5a   : > { %v3337_v26 = vld [vmem:[#allocation4 + $0x20] ss:$16 sps:$4 sm:$0xff]   ;;  %v3338_v27 = vld [vmem:[#allocation4 + $0x28] ss:$16 sps:$4 sm:$0xff]   ;;  %v3339_v28 = vld [vmem:[#allocation4 + $0x4] ss:$16 sps:$4 sm:$0xff]  }
  0x5b   : > { %893 = vmatpush1.bf16.msra.mxu0 %v3313_v10  ;;  %1086 = vmatpush1.bf16.msra.mxu1 %v3314_v11  ;;  %v3341_v29 = vld [vmem:[#allocation4 + $0xc] ss:$16 sps:$4 sm:$0xff]   ;;  %v3343_v30 = vld [vmem:[#allocation4] ss:$16 sps:$4 sm:$0xff]   ;;  %v3344_v31 = vld [vmem:[#allocation4 + $0x8] ss:$16 sps:$4 sm:$0xff]  }
  0x5c   : > { %894 = vmatprep.subr.bf16.mxu0 %v3315_v12  ;;  %1087 = vmatprep.subr.bf16.mxu1 %v3317_v13  ;;  %v3345_v32 = vld [vmem:[#allocation4 + $0x1e4] ss:$16 sps:$4 sm:$0xff]   ;;  %v3347_v33 = vld [vmem:[#allocation4 + $0x1ec] ss:$16 sps:$4 sm:$0xff]   ;;  %v3349_v34 = vld [vmem:[#allocation4 + $0x1e0] ss:$16 sps:$4 sm:$0xff]  }
  0x5d   : > { %v3350_v35 = vld [vmem:[#allocation4 + $0x1e8] ss:$16 sps:$4 sm:$0xff]   ;;  %v3351_v36 = vld [vmem:[#allocation4 + $0x1c4] ss:$16 sps:$4 sm:$0xff]   ;;  %v3353_v37 = vld [vmem:[#allocation4 + $0x1cc] ss:$16 sps:$4 sm:$0xff]  }
  0x5e   : > { %v3355_v38 = vld [vmem:[#allocation4 + $0x1c0] ss:$16 sps:$4 sm:$0xff]   ;;  %v3356_v39 = vld [vmem:[#allocation4 + $0x1c8] ss:$16 sps:$4 sm:$0xff]   ;;  %v3357_v40 = vld [vmem:[#allocation4 + $0x1a4] ss:$16 sps:$4 sm:$0xff]  }
  0x5f   : > { %895 = vmatpush1.bf16.msra.mxu0 %v3319_v14  ;;  %1088 = vmatpush1.bf16.msra.mxu1 %v3320_v15  ;;  %v3359_v41 = vld [vmem:[#allocation4 + $0x1ac] ss:$16 sps:$4 sm:$0xff]   ;;  %v3361_v42 = vld [vmem:[#allocation4 + $0x1a0] ss:$16 sps:$4 sm:$0xff]   ;;  %v3362_v43 = vld [vmem:[#allocation4 + $0x1a8] ss:$16 sps:$4 sm:$0xff]  }
  0x60   : > { %896 = vmatprep.subr.bf16.mxu0 %v3321_v16  ;;  %1089 = vmatprep.subr.bf16.mxu1 %v3323_v17  ;;  %v3363_v44 = vld [vmem:[#allocation4 + $0x184] ss:$16 sps:$4 sm:$0xff]   ;;  %v3365_v45 = vld [vmem:[#allocation4 + $0x18c] ss:$16 sps:$4 sm:$0xff]   ;;  %v3367_v48 = vld [vmem:[#allocation4 + $0x180] ss:$16 sps:$4 sm:$0xff]  }
  0x61   : > { %v387_v46 = vld [vmem:[%s3738_s19 + $0x8] sm:$0xff]  ;;  %v389_v47 = vld [vmem:[%s3738_s19 + $0x18] sm:$0xff]  ;;  %v3369_v51 = vld [vmem:[#allocation4 + $0x164] ss:$16 sps:$4 sm:$0xff]   ;;  %s4221_s17 = sadd.s32 4294967295, %s3559_s12   ;;  %vm2611_vm0 = vcmask 523264  }
  0x62   : > { %v3368_v49 = vld [vmem:[#allocation4 + $0x188] ss:$16 sps:$4 sm:$0xff]   ;;  %v451_v50 = vpack.c.bf16 %v389_v47, %v387_v46  ;;  %v3371_v52 = vld [vmem:[#allocation4 + $0x16c] ss:$16 sps:$4 sm:$0xff]   ;;  %v3373_v53 = vld [vmem:[#allocation4 + $0x160] ss:$16 sps:$4 sm:$0xff]  }
  0x63   : > { %897 = vmatpush1.bf16.msra.mxu0 %v3325_v18  ;;  %1090 = vmatpush1.bf16.msra.mxu1 %v3326_v19  ;;  %v3374_v54 = vld [vmem:[#allocation4 + $0x168] ss:$16 sps:$4 sm:$0xff]   ;;  %v3375_v55 = vld [vmem:[#allocation4 + $0x144] ss:$16 sps:$4 sm:$0xff]   ;;  %v3377_v56 = vld [vmem:[#allocation4 + $0x14c] ss:$16 sps:$4 sm:$0xff]  }
  0x64   : > { %898 = vmatprep.subr.bf16.mxu0 %v3327_v20  ;;  %1091 = vmatprep.subr.bf16.mxu1 %v3329_v21  ;;  %v3379_v57 = vld [vmem:[#allocation4 + $0x140] ss:$16 sps:$4 sm:$0xff]   ;;  %v3380_v58 = vld [vmem:[#allocation4 + $0x148] ss:$16 sps:$4 sm:$0xff]   ;;  %v3381_v59 = vld [vmem:[#allocation4 + $0x124] ss:$16 sps:$4 sm:$0xff]  }
  0x65   : > { %920 = vmatprep.mubr.bf16.mxu0 %v451_v50  ;;  %1113 = vmatprep.mubr.bf16.mxu1 %v451_v50  ;;  %v3383_v60 = vld [vmem:[#allocation4 + $0x12c] ss:$16 sps:$4 sm:$0xff]   ;;  %v3385_v61 = vld [vmem:[#allocation4 + $0x120] ss:$16 sps:$4 sm:$0xff]   ;;  %v3386_v62 = vld [vmem:[#allocation4 + $0x128] ss:$16 sps:$4 sm:$0xff]  }
  0x66   : > { %v3387_v63 = vld [vmem:[#allocation4 + $0x104] ss:$16 sps:$4 sm:$0xff]   ;;  %v3389_v0 = vld [vmem:[#allocation4 + $0x10c] ss:$16 sps:$4 sm:$0xff]   ;;  %v3391_v1 = vld [vmem:[#allocation4 + $0x100] ss:$16 sps:$4 sm:$0xff]  }
  0x67   : > { %899 = vmatpush1.bf16.msra.mxu0 %v3331_v22  ;;  %1092 = vmatpush1.bf16.msra.mxu1 %v3332_v23  ;;  %v3392_v2 = vld [vmem:[#allocation4 + $0x108] ss:$16 sps:$4 sm:$0xff]   ;;  %v386_v3 = vld [vmem:[%s3738_s19] sm:$0xff]  ;;  %v388_v4 = vld [vmem:[%s3738_s19 + $0x10] sm:$0xff]  ;;  %s2744_s26 = sshll.u32 %s4221_s17, 5 }
  0x68   : > { %900 = vmatprep.subr.bf16.mxu0 %v3333_v24  ;;  %1093 = vmatprep.subr.bf16.mxu1 %v3335_v25  ;;  %v391_v5 = vld [vmem:[%s3738_s19 + $0x28] sm:$0xff]  ;;  %v393_v6 = vld [vmem:[%s3738_s19 + $0x38] sm:$0xff]  ;;  %v450_v9 = vpack.c.bf16 %v388_v4, %v386_v3  ;;  %v390_v13 = vld [vmem:[%s3738_s19 + $0x20] sm:$0xff]  ;;  %p380_p5 = scmp.lt.s32.totalorder %s2744_s26, 63 }
  0x69   : > { %v3393_v7 = vld [vmem:[#allocation6 + $0x78] sm:$0xff]   ;;  %v453_v10 = vpack.c.bf16 %v393_v6, %v391_v5  ;;  %v3397_v14 = vld [vmem:[#allocation6 + $0x70] sm:$0xff]   ;;  %v395_v17 = vld [vmem:[%s3738_s19 + $0x48] sm:$0xff] }
  0x6a   : > { %v3395_v8 = vld [vmem:[#allocation6 + $0xf8] sm:$0xff]   ;;  %v3399_v15 = vld [vmem:[#allocation6 + $0xf0] sm:$0xff]   ;;  %v3401_v21 = vld [vmem:[#allocation6 + $0x68] sm:$0xff]   ;;  %s4227_s26 = smov (!%p380_p5, %s2744_s26), 63 }
  0x6b   : > { %901 = vmatpush1.bf16.msra.mxu0 %v3337_v26  ;;  %1094 = vmatpush1.bf16.msra.mxu1 %v3338_v27  ;;  %v3394_v11 = vld [vmem:[#allocation6 + $0x38] sm:$0xff]   ;;  %v392_v16 = vld [vmem:[%s3738_s19 + $0x30] sm:$0xff]  ;;  %v3403_v24 = vld [vmem:[#allocation6 + $0xe8] sm:$0xff]   ;;  %s2745_s21 = sshll.u32 %s4227_s26, 3 }
  0x6c   : > { %902 = vmatprep.subr.bf16.mxu0 %v3339_v28  ;;  %1095 = vmatprep.subr.bf16.mxu1 %v3341_v29  ;;  %v3396_v12 = vld [vmem:[#allocation6 + $0xb8] sm:$0xff]   ;;  %v3398_v19 = vld [vmem:[#allocation6 + $0x30] sm:$0xff]   ;;  %v452_v22 = vpack.c.bf16 %v392_v16, %v390_v13  ;;  %v3402_v25 = vld [vmem:[#allocation6 + $0x28] sm:$0xff]   ;;  %s4083_s24 = scalar_lea.vmem %s4203_s9, %s2745_s21 }
  0x6d   : > { %v397_v18 = vld [vmem:[%s3738_s19 + $0x58] sm:$0xff]  ;;  %v3400_v20 = vld [vmem:[#allocation6 + $0xb0] sm:$0xff]   ;;  %v394_v26 = vld [vmem:[%s3738_s19 + $0x40] sm:$0xff] }
  0x6e   : > { %v455_v23 = vpack.c.bf16 %v397_v18, %v395_v17  ;;  %v3404_v27 = vld [vmem:[#allocation6 + $0xa8] sm:$0xff]   ;;  %v396_v28 = vld [vmem:[%s3738_s19 + $0x50] sm:$0xff]  ;;  %v413_v3 = vld [vmem:[%s3738_s19 + $0xd8] sm:$0xff] }
  0x6f   : > { %903 = vmatpush1.bf16.msra.mxu0 %v3343_v30  ;;  %1096 = vmatpush1.bf16.msra.mxu1 %v3344_v31  ;;  %v399_v29 = vld [vmem:[%s3738_s19 + $0x68] sm:$0xff]  ;;  %v401_v30 = vld [vmem:[%s3738_s19 + $0x78] sm:$0xff]  ;;  %v3405_v31 = vld [vmem:[#allocation6 + $0x60] sm:$0xff]  }
  0x70   : > { %904 = vmatprep.subr.bf16.mxu0 %v3345_v32  ;;  %1097 = vmatprep.subr.bf16.mxu1 %v3347_v33  ;;  %v3406_v32 = vld [vmem:[#allocation6 + $0x20] sm:$0xff]   ;;  %v3414_v46 = vld [vmem:[#allocation6 + $0x10] sm:$0xff]  }
  0x71   : > { %v3407_v33 = vld [vmem:[#allocation6 + $0xe0] sm:$0xff]   ;;  %v3415_v47 = vld [vmem:[#allocation6 + $0xd0] sm:$0xff]  }
  0x72   : > { %v410_v6 = vld [vmem:[%s3738_s19 + $0xc0] sm:$0xff]  ;;  %v416_v13 = vld [vmem:[%s3738_s19 + $0xf0] sm:$0xff] }
  0x73   : > { %905 = vmatpush2.bf16.msra.mxu0 %v3349_v34  ;;  %1098 = vmatpush2.bf16.msra.mxu1 %v3350_v35  ;;  %v454_v34 = vpack.c.bf16 %v396_v28, %v394_v26  ;;  %v3408_v35 = vld [vmem:[#allocation6 + $0xa0] sm:$0xff]   ;;  %v427_v26 = vld [vmem:[%s3738_s19 + $0x148] sm:$0xff] }
  0x74   : > { %906 = vmatprep.subr.bf16.mxu0 %v3351_v36  ;;  %1099 = vmatprep.subr.bf16.mxu1 %v3353_v37  ;;  %v457_v36 = vpack.c.bf16 %v401_v30, %v399_v29  ;;  %v3409_v37 = vld [vmem:[#allocation6 + $0x58] sm:$0xff]   ;;  %v418_v18 = vld [vmem:[%s3738_s19 + $0x100] sm:$0xff] }
  0x75   : > { %v3424_v28 = vld [vmem:[#allocation6 + $0x80] sm:$0xff]  }
  0x77   : > { %907 = vmatpush2.bf16.msra.mxu0 %v3355_v38  ;;  %1100 = vmatpush2.bf16.msra.mxu1 %v3356_v39  ;;  %v3410_v38 = vld [vmem:[#allocation6 + $0x18] sm:$0xff]   ;;  %v398_v39 = vld [vmem:[%s3738_s19 + $0x60] sm:$0xff] }
  0x78   : > { %908 = vmatprep.subr.bf16.mxu0 %v3357_v40  ;;  %1101 = vmatprep.subr.bf16.mxu1 %v3359_v41  ;;  %v400_v40 = vld [vmem:[%s3738_s19 + $0x70] sm:$0xff]  ;;  %v3411_v41 = vld [vmem:[#allocation6 + $0xd8] sm:$0xff]  }
  0x7b   : > { %909 = vmatpush2.bf16.msra.mxu0 %v3361_v42  ;;  %1102 = vmatpush2.bf16.msra.mxu1 %v3362_v43  ;;  %v403_v42 = vld [vmem:[%s3738_s19 + $0x88] sm:$0xff]  ;;  %v405_v43 = vld [vmem:[%s3738_s19 + $0x98] sm:$0xff] }
  0x7c   : > { %910 = vmatprep.subr.bf16.mxu0 %v3363_v44  ;;  %1103 = vmatprep.subr.bf16.mxu1 %v3365_v45  ;;  %v3412_v44 = vld [vmem:[#allocation6 + $0x98] sm:$0xff]   ;;  %v3413_v45 = vld [vmem:[#allocation6 + $0x50] sm:$0xff]   ;;  %v459_v50 = vpack.c.bf16 %v405_v43, %v403_v42  ;;  %v434_v43 = vld [vmem:[%s3738_s19 + $0x180] sm:$0xff] }
  0x7f   : > { %911 = vmatpush2.bf16.msra.mxu0 %v3367_v48  ;;  %1104 = vmatpush2.bf16.msra.mxu1 %v3368_v49  ;;  %v456_v48 = vpack.c.bf16 %v400_v40, %v398_v39  ;;  %v3416_v49 = vld [vmem:[#allocation6 + $0x90] sm:$0xff]   ;;  %v435_v39 = vld [vmem:[%s3738_s19 + $0x188] sm:$0xff]  ;;  %v437_v40 = vld [vmem:[%s3738_s19 + $0x198] sm:$0xff] }
  0x80   : > { %912 = vmatprep.subr.bf16.mxu0 %v3369_v51  ;;  %1105 = vmatprep.subr.bf16.mxu1 %v3371_v52  ;;  %v3417_v51 = vld [vmem:[#allocation6 + $0x48] sm:$0xff]   ;;  %v475_v42 = vpack.c.bf16 %v437_v40, %v435_v39 }
  0x81   : > { %v3418_v52 = vld [vmem:[#allocation6 + $0x8] sm:$0xff]  }
  0x83   : > { %913 = vmatpush2.bf16.msra.mxu0 %v3373_v53  ;;  %1106 = vmatpush2.bf16.msra.mxu1 %v3374_v54  ;;  %v402_v53 = vld [vmem:[%s3738_s19 + $0x80] sm:$0xff]  ;;  %v404_v54 = vld [vmem:[%s3738_s19 + $0x90] sm:$0xff] }
  0x84   : > { %914 = vmatprep.subr.bf16.mxu0 %v3375_v55  ;;  %1107 = vmatprep.subr.bf16.mxu1 %v3377_v56  ;;  %v3419_v55 = vld [vmem:[#allocation6 + $0xc8] sm:$0xff]  }
  0x85   : > { %v407_v56 = vld [vmem:[%s3738_s19 + $0xa8] sm:$0xff] }
  0x87   : > { %915 = vmatpush2.bf16.msra.mxu0 %v3379_v57  ;;  %1108 = vmatpush2.bf16.msra.mxu1 %v3380_v58  ;;  %v409_v57 = vld [vmem:[%s3738_s19 + $0xb8] sm:$0xff]  ;;  %v3420_v58 = vld [vmem:[#allocation6 + $0x88] sm:$0xff]  }
  0x88   : > { %916 = vmatprep.subr.bf16.mxu0 %v3381_v59  ;;  %1109 = vmatprep.subr.bf16.mxu1 %v3383_v60  ;;  %v3421_v59 = vld [vmem:[#allocation6 + $0x40] sm:$0xff]  }
  0x89   : > { %v3422_v60 = vld [vmem:[#allocation6] sm:$0xff]  }
  0x8b   : > { %917 = vmatpush2.bf16.msra.mxu0 %v3385_v61  ;;  %1110 = vmatpush2.bf16.msra.mxu1 %v3386_v62  ;;  %v3423_v61 = vld [vmem:[#allocation6 + $0xc0] sm:$0xff]   ;;  %v458_v62 = vpack.c.bf16 %v404_v54, %v402_v53 }
  0x8c   : > { %918 = vmatprep.subr.bf16.mxu0 %v3387_v63  ;;  %1111 = vmatprep.subr.bf16.mxu1 %v3389_v0  ;;  %v461_v63 = vpack.c.bf16 %v409_v57, %v407_v56  ;;  %v406_v0 = vld [vmem:[%s3738_s19 + $0xa0] sm:$0xff]  ;;  %v444_v56 = vld [vmem:[%s3738_s19 + $0x1d0] sm:$0xff]  ;;  %v447_v57 = vld [vmem:[%s3738_s19 + $0x1e8] sm:$0xff] }
  0x8f   : > { %919 = vmatpush2.bf16.msra.mxu0 %v3391_v1  ;;  %1112 = vmatpush2.bf16.msra.mxu1 %v3392_v2  ;;  %v408_v1 = vld [vmem:[%s3738_s19 + $0xb0] sm:$0xff]  ;;  %v411_v2 = vld [vmem:[%s3738_s19 + $0xc8] sm:$0xff] }
  0x90   : > { %2865 = vmatprep.subr.bf16.mxu0 %v3393_v7  ;;  %2977 = vmatprep.subr.bf16.mxu1 %v3395_v8  ;;  %v460_v4 = vpack.c.bf16 %v408_v1, %v406_v0  ;;  %v463_v5 = vpack.c.bf16 %v413_v3, %v411_v2  ;;  %v412_v7 = vld [vmem:[%s3738_s19 + $0xd0] sm:$0xff]  ;;  %v415_v8 = vld [vmem:[%s3738_s19 + $0xe8] sm:$0xff]  ;;  %v548_v0 = vlaneseq }
  0x92   : > { %921 = vmatmul.mubr.bf16.vlgmr.msra.gmra.mxu0 %v450_v9  ;;  %1114 = vmatmul.mubr.bf16.vlgmr.msra.gmra.mxu1 %v450_v9  ;;  %v417_v9 = vld [vmem:[%s3738_s19 + $0xf8] sm:$0xff]  ;;  %v549_v1 = vshrl.u32 %v548_v0, 7 }
  0x93   : > { %930 = vmatprep.mubr.bf16.mxu0 %v453_v10  ;;  %1123 = vmatprep.mubr.bf16.mxu1 %v453_v10  ;;  %v462_v10 = vpack.c.bf16 %v412_v7, %v410_v6  ;;  %v546_v6 = vld [vmem:[%s4196_s2] sm:$0xf] }
  0x94   : > { %2866 = vmatpush3.bf16.msra.mxu0 %v3394_v11  ;;  %2978 = vmatpush3.bf16.msra.mxu1 %v3396_v12  ;;  %v465_v11 = vpack.c.bf16 %v417_v9, %v415_v8  ;;  %v414_v12 = vld [vmem:[%s3738_s19 + $0xe0] sm:$0xff]  ;;  %v554_v2 = vsub.s32 1, %v549_v1  ;;  %v562_v3 = vsub.s32 3, %v549_v1 }
  0x95   : > { %2867 = vmatprep.subr.bf16.mxu0 %v3397_v14  ;;  %2979 = vmatprep.subr.bf16.mxu1 %v3399_v15  ;;  %v419_v14 = vld [vmem:[%s3738_s19 + $0x108] sm:$0xff]  ;;  %v421_v15 = vld [vmem:[%s3738_s19 + $0x118] sm:$0xff]  ;;  %v464_v16 = vpack.c.bf16 %v416_v13, %v414_v12 }
  0x96   : > { %v467_v17 = vpack.c.bf16 %v421_v15, %v419_v14  ;;  %v3815_v9 = vrot.slane %v546_v6, %v554_v2 }
  0x98   : > { %2868 = vmatpush3.bf16.msra.mxu0 %v3398_v19  ;;  %2980 = vmatpush3.bf16.msra.mxu1 %v3400_v20  ;;  %v420_v19 = vld [vmem:[%s3738_s19 + $0x110] sm:$0xff]  ;;  %v423_v20 = vld [vmem:[%s3738_s19 + $0x128] sm:$0xff] }
  0x99   : > { %2869 = vmatprep.subr.bf16.mxu0 %v3401_v21  ;;  %2981 = vmatprep.subr.bf16.mxu1 %v3403_v24  ;;  %v425_v21 = vld [vmem:[%s3738_s19 + $0x138] sm:$0xff]  ;;  %v422_v24 = vld [vmem:[%s3738_s19 + $0x120] sm:$0xff] }
  0x9a   : > { %931 = vmatmul.mubr.bf16.gmra.mxu0 %v452_v22  ;;  %1124 = vmatmul.mubr.bf16.gmra.mxu1 %v452_v22  ;;  %v466_v22 = vpack.c.bf16 %v420_v19, %v418_v18 }
  0x9b   : > { %940 = vmatprep.mubr.bf16.mxu0 %v455_v23  ;;  %1133 = vmatprep.mubr.bf16.mxu1 %v455_v23  ;;  %v469_v23 = vpack.c.bf16 %v425_v21, %v423_v20 }
  0x9c   : > { %2870 = vmatpush3.bf16.msra.mxu0 %v3402_v25  ;;  %2982 = vmatpush3.bf16.msra.mxu1 %v3404_v27  ;;  %v424_v25 = vld [vmem:[%s3738_s19 + $0x130] sm:$0xff]  ;;  %v429_v27 = vld [vmem:[%s3738_s19 + $0x158] sm:$0xff] }
  0x9d   : > { %2871 = vmatprep.subr.bf16.mxu0 %v3405_v31  ;;  %2983 = vmatprep.subr.bf16.mxu1 %v3407_v33  ;;  %v468_v29 = vpack.c.bf16 %v424_v25, %v422_v24  ;;  %v471_v30 = vpack.c.bf16 %v429_v27, %v427_v26  ;;  %v426_v31 = vld [vmem:[%s3738_s19 + $0x140] sm:$0xff]  ;;  %v431_v33 = vld [vmem:[%s3738_s19 + $0x168] sm:$0xff]  ;;  %v3425_v25 = vld [vmem:[%s4199_s5 + $0x38] sm:$0xff]  }
  0xa0   : > { %2872 = vmatpush3.bf16.msra.mxu0 %v3406_v32  ;;  %2984 = vmatpush3.bf16.msra.mxu1 %v3408_v35  ;;  %v428_v32 = vld [vmem:[%s3738_s19 + $0x150] sm:$0xff] }
  0xa1   : > { %2873 = vmatprep.subr.bf16.mxu0 %v3409_v37  ;;  %2985 = vmatprep.subr.bf16.mxu1 %v3411_v41  ;;  %v470_v35 = vpack.c.bf16 %v428_v32, %v426_v31  ;;  %v430_v37 = vld [vmem:[%s3738_s19 + $0x160] sm:$0xff] }
  0xa2   : > { %941 = vmatmul.mubr.bf16.gmra.mxu0 %v454_v34  ;;  %1134 = vmatmul.mubr.bf16.gmra.mxu1 %v454_v34  ;;  %v433_v34 = vld [vmem:[%s3738_s19 + $0x178] sm:$0xff] }
  0xa3   : > { %950 = vmatprep.mubr.bf16.mxu0 %v457_v36  ;;  %1143 = vmatprep.mubr.bf16.mxu1 %v457_v36  ;;  %v473_v36 = vpack.c.bf16 %v433_v34, %v431_v33 }
  0xa4   : > { %2874 = vmatpush3.bf16.msra.mxu0 %v3410_v38  ;;  %2986 = vmatpush3.bf16.msra.mxu1 %v3412_v44  ;;  %v432_v38 = vld [vmem:[%s3738_s19 + $0x170] sm:$0xff] }
  0xa5   : > { %2875 = vmatprep.subr.bf16.mxu0 %v3413_v45  ;;  %2987 = vmatprep.subr.bf16.mxu1 %v3415_v47  ;;  %v472_v41 = vpack.c.bf16 %v432_v38, %v430_v37  ;;  %v436_v44 = vld [vmem:[%s3738_s19 + $0x190] sm:$0xff]  ;;  %v439_v45 = vld [vmem:[%s3738_s19 + $0x1a8] sm:$0xff] }
  0xa6   : > { %v474_v47 = vpack.c.bf16 %v436_v44, %v434_v43 }
  0xa8   : > { %2876 = vmatpush3.bf16.msra.mxu0 %v3414_v46  ;;  %2988 = vmatpush3.bf16.msra.mxu1 %v3416_v49  ;;  %v441_v46 = vld [vmem:[%s3738_s19 + $0x1b8] sm:$0xff]  ;;  %v438_v49 = vld [vmem:[%s3738_s19 + $0x1a0] sm:$0xff] }
  0xa9   : > { %2877 = vmatprep.subr.bf16.mxu0 %v3417_v51  ;;  %2989 = vmatprep.subr.bf16.mxu1 %v3419_v55  ;;  %v443_v51 = vld [vmem:[%s3738_s19 + $0x1c8] sm:$0xff]  ;;  %v442_v55 = vld [vmem:[%s3738_s19 + $0x1c0] sm:$0xff] }
  0xaa   : > { %951 = vmatmul.mubr.bf16.gmra.mxu0 %v456_v48  ;;  %1144 = vmatmul.mubr.bf16.gmra.mxu1 %v456_v48  ;;  %v477_v48 = vpack.c.bf16 %v441_v46, %v439_v45 }
  0xab   : > { %960 = vmatprep.mubr.bf16.mxu0 %v459_v50  ;;  %1153 = vmatprep.mubr.bf16.mxu1 %v459_v50  ;;  %v440_v50 = vld [vmem:[%s3738_s19 + $0x1b0] sm:$0xff] }
  0xac   : > { %2878 = vmatpush3.bf16.msra.mxu0 %v3418_v52  ;;  %2990 = vmatpush3.bf16.msra.mxu1 %v3420_v58  ;;  %v445_v52 = vld [vmem:[%s3738_s19 + $0x1d8] sm:$0xff]  ;;  %v476_v53 = vpack.c.bf16 %v440_v50, %v438_v49 }
  0xad   : > { %2879 = vmatprep.subr.bf16.mxu0 %v3421_v59  ;;  %2991 = vmatprep.subr.bf16.mxu1 %v3423_v61  ;;  %v479_v54 = vpack.c.bf16 %v445_v52, %v443_v51  ;;  %v449_v58 = vld [vmem:[%s3738_s19 + $0x1f8] sm:$0xff]  ;;  %v478_v59 = vpack.c.bf16 %v444_v56, %v442_v55  ;;  %v446_v61 = vld [vmem:[%s3738_s19 + $0x1e0] sm:$0xff] }
  0xb0   : > { %2880 = vmatpush3.bf16.msra.mxu0 %v3422_v60  ;;  %2992 = vmatpush3.bf16.msra.mxu1 %v3424_v28  ;;  %v481_v60 = vpack.c.bf16 %v449_v58, %v447_v57 }
  0xb1   : > { %3137 = vmatprep.subr.bf16.mxu0 %v3425_v25 }
  0xb2   : > { %961 = vmatmul.mubr.bf16.gmra.mxu0 %v458_v62  ;;  %1154 = vmatmul.mubr.bf16.gmra.mxu1 %v458_v62  ;;  %v448_v62 = vld [vmem:[%s3738_s19 + $0x1f0] sm:$0xff] }
  0xb3   : > { %970 = vmatprep.mubr.bf16.mxu0 %v461_v63  ;;  %1163 = vmatprep.mubr.bf16.mxu1 %v461_v63  ;;  %v480_v63 = vpack.c.bf16 %v448_v62, %v446_v61  ;;  %v3427_v61 = vld [vmem:[%s4199_s5 + $0x28] sm:$0xff]  }
  0xba   : > { %971 = vmatmul.mubr.bf16.gmra.mxu0 %v460_v4  ;;  %1164 = vmatmul.mubr.bf16.gmra.mxu1 %v460_v4  ;;  %v550_v4 = vsub.s32 0, %v549_v1 }
  0xbb   : > { %980 = vmatprep.mubr.bf16.mxu0 %v463_v5  ;;  %1173 = vmatprep.mubr.bf16.mxu1 %v463_v5  ;;  %v558_v5 = vsub.s32 2, %v549_v1 }
  0xbd   : > { %v3821_v12 = vrot.slane %v546_v6, %v558_v5 }
  0xc2   : > { %981 = vmatmul.mubr.bf16.gmra.mxu0 %v462_v10  ;;  %1174 = vmatmul.mubr.bf16.gmra.mxu1 %v462_v10  ;;  %v3817_v10 = vrot.slane %v546_v6, %v562_v3 }
  0xc3   : > { %990 = vmatprep.mubr.bf16.mxu0 %v465_v11  ;;  %1183 = vmatprep.mubr.bf16.mxu1 %v465_v11  ;;  %v3819_v11 = vrot.slane %v546_v6, %v550_v4 }
  0xca   : > { %991 = vmatmul.mubr.bf16.gmra.mxu0 %v464_v16  ;;  %1184 = vmatmul.mubr.bf16.gmra.mxu1 %v464_v16 }
  0xcb   : > { %1000 = vmatprep.mubr.bf16.mxu0 %v467_v17  ;;  %1193 = vmatprep.mubr.bf16.mxu1 %v467_v17 }
  0xd2   : > { %1001 = vmatmul.mubr.bf16.gmra.mxu0 %v466_v22  ;;  %1194 = vmatmul.mubr.bf16.gmra.mxu1 %v466_v22 }
  0xd3   : > { %1010 = vmatprep.mubr.bf16.mxu0 %v469_v23  ;;  %1203 = vmatprep.mubr.bf16.mxu1 %v469_v23 }
  0xda   : > { %1011 = vmatmul.mubr.bf16.gmra.mxu0 %v468_v29  ;;  %1204 = vmatmul.mubr.bf16.gmra.mxu1 %v468_v29 }
  0xdb   : > { %1020 = vmatprep.mubr.bf16.mxu0 %v471_v30  ;;  %1213 = vmatprep.mubr.bf16.mxu1 %v471_v30 }
  0xe2   : > { %1021 = vmatmul.mubr.bf16.gmra.mxu0 %v470_v35  ;;  %1214 = vmatmul.mubr.bf16.gmra.mxu1 %v470_v35 }
  0xe3   : > { %1030 = vmatprep.mubr.bf16.mxu0 %v473_v36  ;;  %1223 = vmatprep.mubr.bf16.mxu1 %v473_v36 }
  0xea   : > { %1031 = vmatmul.mubr.bf16.gmra.mxu0 %v472_v41  ;;  %1224 = vmatmul.mubr.bf16.gmra.mxu1 %v472_v41 }
  0xeb   : > { %1040 = vmatprep.mubr.bf16.mxu0 %v475_v42  ;;  %1233 = vmatprep.mubr.bf16.mxu1 %v475_v42 }
  0xf2   : > { %1041 = vmatmul.mubr.bf16.gmra.mxu0 %v474_v47  ;;  %1234 = vmatmul.mubr.bf16.gmra.mxu1 %v474_v47  ;;  %v3426_v47 = vld [vmem:[%s4199_s5 + $0x30] sm:$0xff]  }
  0xf3   : > { %1050 = vmatprep.mubr.bf16.mxu0 %v477_v48  ;;  %1243 = vmatprep.mubr.bf16.mxu1 %v477_v48 }
  0xfa   : > { %1051 = vmatmul.mubr.bf16.gmra.mxu0 %v476_v53  ;;  %1244 = vmatmul.mubr.bf16.gmra.mxu1 %v476_v53 }
  0xfb   : > { %1060 = vmatprep.mubr.bf16.mxu0 %v479_v54  ;;  %1253 = vmatprep.mubr.bf16.mxu1 %v479_v54 }
 0x102   : > { %1061 = vmatmul.mubr.bf16.gmra.mxu0 %v478_v59  ;;  %1254 = vmatmul.mubr.bf16.gmra.mxu1 %v478_v59 }
 0x103   : > { %1070 = vmatprep.mubr.bf16.mxu0 %v481_v60  ;;  %1263 = vmatprep.mubr.bf16.mxu1 %v481_v60 }
 0x10a   : > { %1071 = vmatmul.mubr.bf16.gmra.mxu0 %v480_v63  ;;  %1264 = vmatmul.mubr.bf16.gmra.mxu1 %v480_v63 }
 0x152   : > { %v922_v7 = vpop.f32.mrf.mxu0  ;;  %v1115_v8 = vpop.f32.mrf.mxu1 }
 0x153   : > { %v923_v21 = vadd.f32 %v922_v7, %v3819_v11  ;;  %v1116_v22 = vadd.f32 %v1115_v8, %v3821_v12 }
 0x154   : > { %v924_v13 = vpop.f32.mrf.mxu0  ;;  %v1117_v14 = vpop.f32.mrf.mxu1 }
 0x155   : > { %v925_v17 = vadd.f32 %v924_v13, %v3815_v9  ;;  %v1118_v18 = vadd.f32 %v1117_v14, %v3817_v10  ;;  %v1274_v36 = vmax.f32 %v923_v21, 0.0  ;;  %v1276_v37 = vmax.f32 %v1116_v22, 0.0 }
 0x156   : > { %v926_v15 = vpop.f32.mrf.mxu0  ;;  %v1119_v16 = vpop.f32.mrf.mxu1 }
 0x157   : > { %v927_v19 = vadd.f32 %v926_v15, %v3819_v11  ;;  %v1120_v20 = vadd.f32 %v1119_v16, %v3821_v12  ;;  %v1275_v32 = vmax.f32 %v925_v17, 0.0  ;;  %v1277_v33 = vmax.f32 %v1118_v18, 0.0 }
 0x158   : > { %v928_v23 = vpop.f32.mrf.mxu0  ;;  %v1121_v24 = vpop.f32.mrf.mxu1 }
 0x159   : > { %v929_v26 = vadd.f32 %v928_v23, %v3815_v9  ;;  %v1122_v27 = vadd.f32 %v1121_v24, %v3817_v10  ;;  %v1278_v28 = vmax.f32 %v927_v19, 0.0  ;;  %v1280_v29 = vmax.f32 %v1120_v20, 0.0 }
 0x15a   : > { %v932_v30 = vpop.f32.mrf.mxu0  ;;  %v1125_v31 = vpop.f32.mrf.mxu1 }
 0x15b   : > { %v1279_v34 = vmax.f32 %v929_v26, 0.0  ;;  %v1281_v35 = vmax.f32 %v1122_v27, 0.0  ;;  %v1402_v42 = vpack.c.bf16 %v1278_v28, %v1274_v36  ;;  %v1404_v43 = vpack.c.bf16 %v1280_v29, %v1276_v37 }
 0x15c   : > { %v934_v38 = vpop.f32.mrf.mxu0  ;;  %v1127_v39 = vpop.f32.mrf.mxu1  ;;  %v933_v51 = vadd.f32 %v932_v30, %v3819_v11  ;;  %v1126_v52 = vadd.f32 %v1125_v31, %v3821_v12 }
 0x15d   : > { %v1403_v40 = vpack.c.bf16 %v1279_v34, %v1275_v32  ;;  %v1405_v41 = vpack.c.bf16 %v1281_v35, %v1277_v33  ;;  %v935_v44 = vadd.f32 %v934_v38, %v3815_v9  ;;  %v1128_v48 = vadd.f32 %v1127_v39, %v3817_v10 }
 0x15e   : > { %v936_v45 = vpop.f32.mrf.mxu0  ;;  %v1129_v46 = vpop.f32.mrf.mxu1  ;;  %v1282_v2 = vmax.f32 %v933_v51, 0.0  ;;  %v1284_v3 = vmax.f32 %v1126_v52, 0.0 }
 0x15f   : > { %v937_v49 = vadd.f32 %v936_v45, %v3819_v11  ;;  %v1130_v50 = vadd.f32 %v1129_v46, %v3821_v12  ;;  %1761 = vmatprep.mubr.bf16.mxu0 %v1403_v40  ;;  %1922 = vmatprep.mubr.bf16.mxu1 %v1405_v41  ;;  %v1283_v62 = vmax.f32 %v935_v44, 0.0  ;;  %v1285_v63 = vmax.f32 %v1128_v48, 0.0 }
 0x160   : > { %v938_v53 = vpop.f32.mrf.mxu0  ;;  %v1131_v54 = vpop.f32.mrf.mxu1  ;;  %1762 = vmatmul.mubr.bf16.vlgmr.msra.gmra.mxu0 %v1402_v42  ;;  %1923 = vmatmul.mubr.bf16.vlgmr.msra.gmra.mxu1 %v1404_v43 }
 0x161   : > { %v939_v55 = vadd.f32 %v938_v53, %v3815_v9  ;;  %v1132_v56 = vadd.f32 %v1131_v54, %v3817_v10  ;;  %3138 = vmatpush3.bf16.msra.mxu0 %v3425_v25  ;;  %v1286_v57 = vmax.f32 %v937_v49, 0.0  ;;  %v1288_v58 = vmax.f32 %v1130_v50, 0.0 }
 0x162   : > { %v942_v59 = vpop.f32.mrf.mxu0  ;;  %v1135_v60 = vpop.f32.mrf.mxu1  ;;  %3139 = vmatprep.subr.bf16.mxu0 %v3426_v47 }
 0x163   : > { %v1287_v0 = vmax.f32 %v939_v55, 0.0  ;;  %v1289_v1 = vmax.f32 %v1132_v56, 0.0  ;;  %v1406_v8 = vpack.c.bf16 %v1286_v57, %v1282_v2  ;;  %v1408_v13 = vpack.c.bf16 %v1288_v58, %v1284_v3 }
 0x164   : > { %v944_v4 = vpop.f32.mrf.mxu0  ;;  %v1137_v5 = vpop.f32.mrf.mxu1  ;;  %v943_v20 = vadd.f32 %v942_v59, %v3819_v11  ;;  %v1136_v21 = vadd.f32 %v1135_v60, %v3821_v12 }
 0x165   : > { %v1407_v6 = vpack.c.bf16 %v1287_v0, %v1283_v62  ;;  %v1409_v7 = vpack.c.bf16 %v1289_v1, %v1285_v63  ;;  %3140 = vmatpush3.bf16.msra.mxu0 %v3426_v47  ;;  %v945_v14 = vadd.f32 %v944_v4, %v3815_v9  ;;  %v1138_v17 = vadd.f32 %v1137_v5, %v3817_v10 }
 0x166   : > { %v946_v15 = vpop.f32.mrf.mxu0  ;;  %v1139_v16 = vpop.f32.mrf.mxu1  ;;  %3141 = vmatprep.subr.bf16.mxu0 %v3427_v61  ;;  %v1290_v34 = vmax.f32 %v943_v20, 0.0  ;;  %v1292_v35 = vmax.f32 %v1136_v21, 0.0 }
 0x167   : > { %v947_v18 = vadd.f32 %v946_v15, %v3819_v11  ;;  %v1140_v19 = vadd.f32 %v1139_v16, %v3821_v12  ;;  %1769 = vmatprep.mubr.bf16.mxu0 %v1407_v6  ;;  %1930 = vmatprep.mubr.bf16.mxu1 %v1409_v7  ;;  %v1291_v30 = vmax.f32 %v945_v14, 0.0  ;;  %v1293_v31 = vmax.f32 %v1138_v17, 0.0 }
 0x168   : > { %v948_v22 = vpop.f32.mrf.mxu0  ;;  %v1141_v23 = vpop.f32.mrf.mxu1  ;;  %1770 = vmatmul.mubr.bf16.gmra.mxu0 %v1406_v8  ;;  %1931 = vmatmul.mubr.bf16.gmra.mxu1 %v1408_v13 }
 0x169   : > { %v949_v24 = vadd.f32 %v948_v22, %v3815_v9  ;;  %v1142_v25 = vadd.f32 %v1141_v23, %v3817_v10  ;;  %3142 = vmatpush3.bf16.msra.mxu0 %v3427_v61  ;;  %v1294_v26 = vmax.f32 %v947_v18, 0.0  ;;  %v1296_v27 = vmax.f32 %v1140_v19, 0.0 }
 0x16a   : > { %v952_v28 = vpop.f32.mrf.mxu0  ;;  %v1145_v29 = vpop.f32.mrf.mxu1 }
 0x16b   : > { %v1295_v32 = vmax.f32 %v949_v24, 0.0  ;;  %v1297_v33 = vmax.f32 %v1142_v25, 0.0  ;;  %v1410_v40 = vpack.c.bf16 %v1294_v26, %v1290_v34  ;;  %v1412_v41 = vpack.c.bf16 %v1296_v27, %v1292_v35 }
 0x16c   : > { %v954_v36 = vpop.f32.mrf.mxu0  ;;  %v1147_v37 = vpop.f32.mrf.mxu1  ;;  %v953_v48 = vadd.f32 %v952_v28, %v3819_v11  ;;  %v1146_v49 = vadd.f32 %v1145_v29, %v3821_v12 }
 0x16d   : > { %v1411_v38 = vpack.c.bf16 %v1295_v32, %v1291_v30  ;;  %v1413_v39 = vpack.c.bf16 %v1297_v33, %v1293_v31  ;;  %v955_v42 = vadd.f32 %v954_v36, %v3815_v9  ;;  %v1148_v45 = vadd.f32 %v1147_v37, %v3817_v10 }
 0x16e   : > { %v956_v43 = vpop.f32.mrf.mxu0  ;;  %v1149_v44 = vpop.f32.mrf.mxu1  ;;  %v1298_v62 = vmax.f32 %v953_v48, 0.0  ;;  %v1300_v63 = vmax.f32 %v1146_v49, 0.0 }
 0x16f   : > { %v957_v46 = vadd.f32 %v956_v43, %v3819_v11  ;;  %v1150_v47 = vadd.f32 %v1149_v44, %v3821_v12  ;;  %1777 = vmatprep.mubr.bf16.mxu0 %v1411_v38  ;;  %1938 = vmatprep.mubr.bf16.mxu1 %v1413_v39  ;;  %v1299_v58 = vmax.f32 %v955_v42, 0.0  ;;  %v1301_v59 = vmax.f32 %v1148_v45, 0.0 }
 0x170   : > { %v958_v50 = vpop.f32.mrf.mxu0  ;;  %v1151_v51 = vpop.f32.mrf.mxu1  ;;  %1778 = vmatmul.mubr.bf16.gmra.mxu0 %v1410_v40  ;;  %1939 = vmatmul.mubr.bf16.gmra.mxu1 %v1412_v41 }
 0x171   : > { %v959_v52 = vadd.f32 %v958_v50, %v3815_v9  ;;  %v1152_v53 = vadd.f32 %v1151_v51, %v3817_v10  ;;  %v1302_v54 = vmax.f32 %v957_v46, 0.0  ;;  %v1304_v55 = vmax.f32 %v1150_v47, 0.0 }
 0x172   : > { %v962_v56 = vpop.f32.mrf.mxu0  ;;  %v1155_v57 = vpop.f32.mrf.mxu1 }
 0x173   : > { %v1303_v60 = vmax.f32 %v959_v52, 0.0  ;;  %v1305_v61 = vmax.f32 %v1152_v53, 0.0  ;;  %v1414_v4 = vpack.c.bf16 %v1302_v54, %v1298_v62  ;;  %v1416_v5 = vpack.c.bf16 %v1304_v55, %v1300_v63 }
 0x174   : > { %v964_v0 = vpop.f32.mrf.mxu0  ;;  %v1157_v1 = vpop.f32.mrf.mxu1  ;;  %v963_v16 = vadd.f32 %v962_v56, %v3819_v11  ;;  %v1156_v17 = vadd.f32 %v1155_v57, %v3821_v12 }
 0x175   : > { %v1415_v2 = vpack.c.bf16 %v1303_v60, %v1299_v58  ;;  %v1417_v3 = vpack.c.bf16 %v1305_v61, %v1301_v59  ;;  %v965_v6 = vadd.f32 %v964_v0, %v3815_v9  ;;  %v1158_v13 = vadd.f32 %v1157_v1, %v3817_v10 }
 0x176   : > { %v966_v7 = vpop.f32.mrf.mxu0  ;;  %v1159_v8 = vpop.f32.mrf.mxu1  ;;  %v1306_v30 = vmax.f32 %v963_v16, 0.0  ;;  %v1308_v31 = vmax.f32 %v1156_v17, 0.0 }
 0x177   : > { %v967_v14 = vadd.f32 %v966_v7, %v3819_v11  ;;  %v1160_v15 = vadd.f32 %v1159_v8, %v3821_v12  ;;  %1785 = vmatprep.mubr.bf16.mxu0 %v1415_v2  ;;  %1946 = vmatprep.mubr.bf16.mxu1 %v1417_v3  ;;  %v1307_v26 = vmax.f32 %v965_v6, 0.0  ;;  %v1309_v27 = vmax.f32 %v1158_v13, 0.0 }
 0x178   : > { %v968_v18 = vpop.f32.mrf.mxu0  ;;  %v1161_v19 = vpop.f32.mrf.mxu1  ;;  %1786 = vmatmul.mubr.bf16.gmra.mxu0 %v1414_v4  ;;  %1947 = vmatmul.mubr.bf16.gmra.mxu1 %v1416_v5 }
 0x179   : > { %v969_v20 = vadd.f32 %v968_v18, %v3815_v9  ;;  %v1162_v21 = vadd.f32 %v1161_v19, %v3817_v10  ;;  %v1310_v22 = vmax.f32 %v967_v14, 0.0  ;;  %v1312_v23 = vmax.f32 %v1160_v15, 0.0 }
 0x17a   : > { %v972_v24 = vpop.f32.mrf.mxu0  ;;  %v1165_v25 = vpop.f32.mrf.mxu1 }
 0x17b   : > { %v1311_v28 = vmax.f32 %v969_v20, 0.0  ;;  %v1313_v29 = vmax.f32 %v1162_v21, 0.0  ;;  %v1418_v36 = vpack.c.bf16 %v1310_v22, %v1306_v30  ;;  %v1420_v37 = vpack.c.bf16 %v1312_v23, %v1308_v31 }
 0x17c   : > { %v974_v32 = vpop.f32.mrf.mxu0  ;;  %v1167_v33 = vpop.f32.mrf.mxu1  ;;  %v973_v44 = vadd.f32 %v972_v24, %v3819_v11  ;;  %v1166_v45 = vadd.f32 %v1165_v25, %v3821_v12 }
 0x17d   : > { %v1419_v34 = vpack.c.bf16 %v1311_v28, %v1307_v26  ;;  %v1421_v35 = vpack.c.bf16 %v1313_v29, %v1309_v27  ;;  %v975_v38 = vadd.f32 %v974_v32, %v3815_v9  ;;  %v1168_v41 = vadd.f32 %v1167_v33, %v3817_v10 }
 0x17e   : > { %v976_v39 = vpop.f32.mrf.mxu0  ;;  %v1169_v40 = vpop.f32.mrf.mxu1  ;;  %v1314_v58 = vmax.f32 %v973_v44, 0.0  ;;  %v1316_v59 = vmax.f32 %v1166_v45, 0.0 }
 0x17f   : > { %v977_v42 = vadd.f32 %v976_v39, %v3819_v11  ;;  %v1170_v43 = vadd.f32 %v1169_v40, %v3821_v12  ;;  %1793 = vmatprep.mubr.bf16.mxu0 %v1419_v34  ;;  %1954 = vmatprep.mubr.bf16.mxu1 %v1421_v35  ;;  %v1315_v54 = vmax.f32 %v975_v38, 0.0  ;;  %v1317_v55 = vmax.f32 %v1168_v41, 0.0 }
 0x180   : > { %v978_v46 = vpop.f32.mrf.mxu0  ;;  %v1171_v47 = vpop.f32.mrf.mxu1  ;;  %1794 = vmatmul.mubr.bf16.gmra.mxu0 %v1418_v36  ;;  %1955 = vmatmul.mubr.bf16.gmra.mxu1 %v1420_v37 }
 0x181   : > { %v979_v48 = vadd.f32 %v978_v46, %v3815_v9  ;;  %v1172_v49 = vadd.f32 %v1171_v47, %v3817_v10  ;;  %v1318_v50 = vmax.f32 %v977_v42, 0.0  ;;  %v1320_v51 = vmax.f32 %v1170_v43, 0.0 }
 0x182   : > { %v982_v52 = vpop.f32.mrf.mxu0  ;;  %v1175_v53 = vpop.f32.mrf.mxu1 }
 0x183   : > { %v1319_v56 = vmax.f32 %v979_v48, 0.0  ;;  %v1321_v57 = vmax.f32 %v1172_v49, 0.0  ;;  %v1422_v0 = vpack.c.bf16 %v1318_v50, %v1314_v58  ;;  %v1424_v1 = vpack.c.bf16 %v1320_v51, %v1316_v59 }
 0x184   : > { %v984_v60 = vpop.f32.mrf.mxu0  ;;  %v1177_v61 = vpop.f32.mrf.mxu1  ;;  %v983_v8 = vadd.f32 %v982_v52, %v3819_v11  ;;  %v1176_v13 = vadd.f32 %v1175_v53, %v3821_v12 }
 0x185   : > { %v1423_v62 = vpack.c.bf16 %v1319_v56, %v1315_v54  ;;  %v1425_v63 = vpack.c.bf16 %v1321_v57, %v1317_v55  ;;  %v985_v2 = vadd.f32 %v984_v60, %v3815_v9  ;;  %v1178_v5 = vadd.f32 %v1177_v61, %v3817_v10 }
 0x186   : > { %v986_v3 = vpop.f32.mrf.mxu0  ;;  %v1179_v4 = vpop.f32.mrf.mxu1  ;;  %v1322_v26 = vmax.f32 %v983_v8, 0.0  ;;  %v1324_v27 = vmax.f32 %v1176_v13, 0.0 }
 0x187   : > { %v987_v6 = vadd.f32 %v986_v3, %v3819_v11  ;;  %v1180_v7 = vadd.f32 %v1179_v4, %v3821_v12  ;;  %1801 = vmatprep.mubr.bf16.mxu0 %v1423_v62  ;;  %1962 = vmatprep.mubr.bf16.mxu1 %v1425_v63  ;;  %v1323_v22 = vmax.f32 %v985_v2, 0.0  ;;  %v1325_v23 = vmax.f32 %v1178_v5, 0.0 }
 0x188   : > { %v988_v14 = vpop.f32.mrf.mxu0  ;;  %v1181_v15 = vpop.f32.mrf.mxu1  ;;  %1802 = vmatmul.mubr.bf16.gmra.mxu0 %v1422_v0  ;;  %1963 = vmatmul.mubr.bf16.gmra.mxu1 %v1424_v1 }
 0x189   : > { %v989_v16 = vadd.f32 %v988_v14, %v3815_v9  ;;  %v1182_v17 = vadd.f32 %v1181_v15, %v3817_v10  ;;  %v1326_v18 = vmax.f32 %v987_v6, 0.0  ;;  %v1328_v19 = vmax.f32 %v1180_v7, 0.0 }
 0x18a   : > { %v992_v20 = vpop.f32.mrf.mxu0  ;;  %v1185_v21 = vpop.f32.mrf.mxu1 }
 0x18b   : > { %v1327_v24 = vmax.f32 %v989_v16, 0.0  ;;  %v1329_v25 = vmax.f32 %v1182_v17, 0.0  ;;  %v1426_v32 = vpack.c.bf16 %v1326_v18, %v1322_v26  ;;  %v1428_v33 = vpack.c.bf16 %v1328_v19, %v1324_v27 }
 0x18c   : > { %v994_v28 = vpop.f32.mrf.mxu0  ;;  %v1187_v29 = vpop.f32.mrf.mxu1  ;;  %v993_v40 = vadd.f32 %v992_v20, %v3819_v11  ;;  %v1186_v41 = vadd.f32 %v1185_v21, %v3821_v12 }
 0x18d   : > { %v1427_v30 = vpack.c.bf16 %v1327_v24, %v1323_v22  ;;  %v1429_v31 = vpack.c.bf16 %v1329_v25, %v1325_v23  ;;  %v995_v34 = vadd.f32 %v994_v28, %v3815_v9  ;;  %v1188_v37 = vadd.f32 %v1187_v29, %v3817_v10 }
 0x18e   : > { %v996_v35 = vpop.f32.mrf.mxu0  ;;  %v1189_v36 = vpop.f32.mrf.mxu1  ;;  %v1330_v54 = vmax.f32 %v993_v40, 0.0  ;;  %v1332_v55 = vmax.f32 %v1186_v41, 0.0  ;;  %v3428_v40 = vld [vmem:[%s4199_s5 + $0x20] sm:$0xff]  }
 0x18f   : > { %v997_v38 = vadd.f32 %v996_v35, %v3819_v11  ;;  %v1190_v39 = vadd.f32 %v1189_v36, %v3821_v12  ;;  %1809 = vmatprep.mubr.bf16.mxu0 %v1427_v30  ;;  %1970 = vmatprep.mubr.bf16.mxu1 %v1429_v31  ;;  %v1331_v50 = vmax.f32 %v995_v34, 0.0  ;;  %v1333_v51 = vmax.f32 %v1188_v37, 0.0 }
 0x190   : > { %v998_v42 = vpop.f32.mrf.mxu0  ;;  %v1191_v43 = vpop.f32.mrf.mxu1  ;;  %1810 = vmatmul.mubr.bf16.gmra.mxu0 %v1426_v32  ;;  %1971 = vmatmul.mubr.bf16.gmra.mxu1 %v1428_v33 }
 0x191   : > { %v999_v44 = vadd.f32 %v998_v42, %v3815_v9  ;;  %v1192_v45 = vadd.f32 %v1191_v43, %v3817_v10  ;;  %v1334_v46 = vmax.f32 %v997_v38, 0.0  ;;  %v1336_v47 = vmax.f32 %v1190_v39, 0.0  ;;  %3143 = vmatprep.subr.bf16.mxu0 %v3428_v40 }
 0x192   : > { %v1002_v48 = vpop.f32.mrf.mxu0  ;;  %v1195_v49 = vpop.f32.mrf.mxu1  ;;  %3144 = vmatpush3.bf16.msra.mxu0 %v3428_v40 }
 0x193   : > { %v1335_v52 = vmax.f32 %v999_v44, 0.0  ;;  %v1337_v53 = vmax.f32 %v1192_v45, 0.0  ;;  %v1430_v60 = vpack.c.bf16 %v1334_v46, %v1330_v54  ;;  %v1432_v61 = vpack.c.bf16 %v1336_v47, %v1332_v55 }
 0x194   : > { %v1004_v56 = vpop.f32.mrf.mxu0  ;;  %v1197_v57 = vpop.f32.mrf.mxu1  ;;  %v1003_v4 = vadd.f32 %v1002_v48, %v3819_v11  ;;  %v1196_v5 = vadd.f32 %v1195_v49, %v3821_v12 }
 0x195   : > { %v1431_v58 = vpack.c.bf16 %v1335_v52, %v1331_v50  ;;  %v1433_v59 = vpack.c.bf16 %v1337_v53, %v1333_v51  ;;  %v1005_v62 = vadd.f32 %v1004_v56, %v3815_v9  ;;  %v1198_v1 = vadd.f32 %v1197_v57, %v3817_v10 }
 0x196   : > { %v1006_v63 = vpop.f32.mrf.mxu0  ;;  %v1199_v0 = vpop.f32.mrf.mxu1  ;;  %v1338_v22 = vmax.f32 %v1003_v4, 0.0  ;;  %v1340_v23 = vmax.f32 %v1196_v5, 0.0  ;;  %v3429_v5 = vld [vmem:[%s4199_s5 + $0x18] sm:$0xff]  }
 0x197   : > { %v1007_v2 = vadd.f32 %v1006_v63, %v3819_v11  ;;  %v1200_v3 = vadd.f32 %v1199_v0, %v3821_v12  ;;  %1817 = vmatprep.mubr.bf16.mxu0 %v1431_v58  ;;  %1978 = vmatprep.mubr.bf16.mxu1 %v1433_v59  ;;  %v1339_v18 = vmax.f32 %v1005_v62, 0.0  ;;  %v1341_v19 = vmax.f32 %v1198_v1, 0.0 }
 0x198   : > { %v1008_v6 = vpop.f32.mrf.mxu0  ;;  %v1201_v7 = vpop.f32.mrf.mxu1  ;;  %1818 = vmatmul.mubr.bf16.gmra.mxu0 %v1430_v60  ;;  %1979 = vmatmul.mubr.bf16.gmra.mxu1 %v1432_v61 }
 0x199   : > { %v1009_v8 = vadd.f32 %v1008_v6, %v3815_v9  ;;  %v1202_v13 = vadd.f32 %v1201_v7, %v3817_v10  ;;  %v1342_v14 = vmax.f32 %v1007_v2, 0.0  ;;  %v1344_v15 = vmax.f32 %v1200_v3, 0.0  ;;  %3145 = vmatprep.subr.bf16.mxu0 %v3429_v5 }
 0x19a   : > { %v1012_v16 = vpop.f32.mrf.mxu0  ;;  %v1205_v17 = vpop.f32.mrf.mxu1  ;;  %3146 = vmatpush3.bf16.msra.mxu0 %v3429_v5 }
 0x19b   : > { %v1343_v20 = vmax.f32 %v1009_v8, 0.0  ;;  %v1345_v21 = vmax.f32 %v1202_v13, 0.0  ;;  %v1434_v28 = vpack.c.bf16 %v1342_v14, %v1338_v22  ;;  %v1436_v29 = vpack.c.bf16 %v1344_v15, %v1340_v23 }
 0x19c   : > { %v1014_v24 = vpop.f32.mrf.mxu0  ;;  %v1207_v25 = vpop.f32.mrf.mxu1  ;;  %v1013_v36 = vadd.f32 %v1012_v16, %v3819_v11  ;;  %v1206_v37 = vadd.f32 %v1205_v17, %v3821_v12 }
 0x19d   : > { %v1435_v26 = vpack.c.bf16 %v1343_v20, %v1339_v18  ;;  %v1437_v27 = vpack.c.bf16 %v1345_v21, %v1341_v19  ;;  %v1015_v30 = vadd.f32 %v1014_v24, %v3815_v9  ;;  %v1208_v33 = vadd.f32 %v1207_v25, %v3817_v10  ;;  %v3430_v24 = vld [vmem:[%s4199_s5 + $0x10] sm:$0xff]  }
 0x19e   : > { %v1016_v31 = vpop.f32.mrf.mxu0  ;;  %v1209_v32 = vpop.f32.mrf.mxu1  ;;  %v1346_v51 = vmax.f32 %v1013_v36, 0.0  ;;  %v1348_v52 = vmax.f32 %v1206_v37, 0.0  ;;  %3147 = vmatprep.subr.bf16.mxu0 %v3430_v24 }
 0x19f   : > { %v1017_v34 = vadd.f32 %v1016_v31, %v3819_v11  ;;  %v1210_v35 = vadd.f32 %v1209_v32, %v3821_v12  ;;  %1825 = vmatprep.mubr.bf16.mxu0 %v1435_v26  ;;  %1986 = vmatprep.mubr.bf16.mxu1 %v1437_v27  ;;  %v1347_v47 = vmax.f32 %v1015_v30, 0.0  ;;  %v1349_v48 = vmax.f32 %v1208_v33, 0.0 }
 0x1a0   : > { %v1018_v38 = vpop.f32.mrf.mxu0  ;;  %v1211_v39 = vpop.f32.mrf.mxu1  ;;  %1826 = vmatmul.mubr.bf16.gmra.mxu0 %v1434_v28  ;;  %1987 = vmatmul.mubr.bf16.gmra.mxu1 %v1436_v29 }
 0x1a1   : > { %v1019_v41 = vadd.f32 %v1018_v38, %v3815_v9  ;;  %v1212_v42 = vadd.f32 %v1211_v39, %v3817_v10  ;;  %v1350_v43 = vmax.f32 %v1017_v34, 0.0  ;;  %v1352_v44 = vmax.f32 %v1210_v35, 0.0  ;;  %v3431_v39 = vld [vmem:[%s4199_s5 + $0x8] sm:$0xff]   ;;  %3148 = vmatpush3.bf16.msra.mxu0 %v3430_v24 }
 0x1a2   : > { %v1022_v45 = vpop.f32.mrf.mxu0  ;;  %v1215_v46 = vpop.f32.mrf.mxu1  ;;  %3149 = vmatprep.subr.bf16.mxu0 %v3431_v39 }
 0x1a3   : > { %v1351_v49 = vmax.f32 %v1019_v41, 0.0  ;;  %v1353_v50 = vmax.f32 %v1212_v42, 0.0  ;;  %v1438_v57 = vpack.c.bf16 %v1350_v43, %v1346_v51  ;;  %v1440_v58 = vpack.c.bf16 %v1352_v44, %v1348_v52 }
 0x1a4   : > { %v1024_v53 = vpop.f32.mrf.mxu0  ;;  %v1217_v54 = vpop.f32.mrf.mxu1  ;;  %v1023_v1 = vadd.f32 %v1022_v45, %v3819_v11  ;;  %v1216_v2 = vadd.f32 %v1215_v46, %v3821_v12 }
 0x1a5   : > { %v1439_v55 = vpack.c.bf16 %v1351_v49, %v1347_v47  ;;  %v1441_v56 = vpack.c.bf16 %v1353_v50, %v1349_v48  ;;  %v1025_v59 = vadd.f32 %v1024_v53, %v3815_v9  ;;  %v1218_v62 = vadd.f32 %v1217_v54, %v3817_v10  ;;  %v3432_v54 = vld [vmem:[%s4199_s5] sm:$0xff]   ;;  %3150 = vmatpush3.bf16.msra.mxu0 %v3431_v39 }
 0x1a6   : > { %v1026_v60 = vpop.f32.mrf.mxu0  ;;  %v1219_v61 = vpop.f32.mrf.mxu1  ;;  %v1354_v20 = vmax.f32 %v1023_v1, 0.0  ;;  %v1356_v21 = vmax.f32 %v1216_v2, 0.0  ;;  %3151 = vmatprep.subr.bf16.mxu0 %v3432_v54 }
 0x1a7   : > { %v1027_v63 = vadd.f32 %v1026_v60, %v3819_v11  ;;  %v1220_v0 = vadd.f32 %v1219_v61, %v3821_v12  ;;  %1833 = vmatprep.mubr.bf16.mxu0 %v1439_v55  ;;  %1994 = vmatprep.mubr.bf16.mxu1 %v1441_v56  ;;  %v1355_v16 = vmax.f32 %v1025_v59, 0.0  ;;  %v1357_v17 = vmax.f32 %v1218_v62, 0.0 }
 0x1a8   : > { %v1028_v3 = vpop.f32.mrf.mxu0  ;;  %v1221_v4 = vpop.f32.mrf.mxu1  ;;  %1834 = vmatmul.mubr.bf16.gmra.mxu0 %v1438_v57  ;;  %1995 = vmatmul.mubr.bf16.gmra.mxu1 %v1440_v58 }
 0x1a9   : > { %v1029_v6 = vadd.f32 %v1028_v3, %v3815_v9  ;;  %v1222_v7 = vadd.f32 %v1221_v4, %v3817_v10  ;;  %v1358_v8 = vmax.f32 %v1027_v63, 0.0  ;;  %v1360_v13 = vmax.f32 %v1220_v0, 0.0  ;;  %3152 = vmatpush3.bf16.msra.mxu0 %v3432_v54 }
 0x1aa   : > { %v1032_v14 = vpop.f32.mrf.mxu0  ;;  %v1225_v15 = vpop.f32.mrf.mxu1 }
 0x1ab   : > { %v1359_v18 = vmax.f32 %v1029_v6, 0.0  ;;  %v1361_v19 = vmax.f32 %v1222_v7, 0.0  ;;  %v1442_v27 = vpack.c.bf16 %v1358_v8, %v1354_v20  ;;  %v1444_v28 = vpack.c.bf16 %v1360_v13, %v1356_v21 }
 0x1ac   : > { %v1034_v22 = vpop.f32.mrf.mxu0  ;;  %v1227_v23 = vpop.f32.mrf.mxu1  ;;  %v1033_v35 = vadd.f32 %v1032_v14, %v3819_v11  ;;  %v1226_v36 = vadd.f32 %v1225_v15, %v3821_v12 }
 0x1ad   : > { %v1443_v25 = vpack.c.bf16 %v1359_v18, %v1355_v16  ;;  %v1445_v26 = vpack.c.bf16 %v1361_v19, %v1357_v17  ;;  %v1035_v29 = vadd.f32 %v1034_v22, %v3815_v9  ;;  %v1228_v32 = vadd.f32 %v1227_v23, %v3817_v10 }
 0x1ae   : > { %v1036_v30 = vpop.f32.mrf.mxu0  ;;  %v1229_v31 = vpop.f32.mrf.mxu1  ;;  %v1362_v50 = vmax.f32 %v1033_v35, 0.0  ;;  %v1364_v51 = vmax.f32 %v1226_v36, 0.0 }
 0x1af   : > { %v1037_v33 = vadd.f32 %v1036_v30, %v3819_v11  ;;  %v1230_v34 = vadd.f32 %v1229_v31, %v3821_v12  ;;  %1841 = vmatprep.mubr.bf16.mxu0 %v1443_v25  ;;  %2002 = vmatprep.mubr.bf16.mxu1 %v1445_v26  ;;  %v1363_v46 = vmax.f32 %v1035_v29, 0.0  ;;  %v1365_v47 = vmax.f32 %v1228_v32, 0.0 }
 0x1b0   : > { %v1038_v37 = vpop.f32.mrf.mxu0  ;;  %v1231_v38 = vpop.f32.mrf.mxu1  ;;  %1842 = vmatmul.mubr.bf16.gmra.mxu0 %v1442_v27  ;;  %2003 = vmatmul.mubr.bf16.gmra.mxu1 %v1444_v28 }
 0x1b1   : > { %v1039_v40 = vadd.f32 %v1038_v37, %v3815_v9  ;;  %v1232_v41 = vadd.f32 %v1231_v38, %v3817_v10  ;;  %v1366_v42 = vmax.f32 %v1037_v33, 0.0  ;;  %v1368_v43 = vmax.f32 %v1230_v34, 0.0 }
 0x1b2   : > { %v1042_v44 = vpop.f32.mrf.mxu0  ;;  %v1235_v45 = vpop.f32.mrf.mxu1 }
 0x1b3   : > { %v1367_v48 = vmax.f32 %v1039_v40, 0.0  ;;  %v1369_v49 = vmax.f32 %v1232_v41, 0.0  ;;  %v1446_v57 = vpack.c.bf16 %v1366_v42, %v1362_v50  ;;  %v1448_v58 = vpack.c.bf16 %v1368_v43, %v1364_v51 }
 0x1b4   : > { %v1044_v52 = vpop.f32.mrf.mxu0  ;;  %v1237_v53 = vpop.f32.mrf.mxu1  ;;  %v1043_v1 = vadd.f32 %v1042_v44, %v3819_v11  ;;  %v1236_v2 = vadd.f32 %v1235_v45, %v3821_v12 }
 0x1b5   : > { %v1447_v55 = vpack.c.bf16 %v1367_v48, %v1363_v46  ;;  %v1449_v56 = vpack.c.bf16 %v1369_v49, %v1365_v47  ;;  %v1045_v59 = vadd.f32 %v1044_v52, %v3815_v9  ;;  %v1238_v62 = vadd.f32 %v1237_v53, %v3817_v10 }
 0x1b6   : > { %v1046_v60 = vpop.f32.mrf.mxu0  ;;  %v1239_v61 = vpop.f32.mrf.mxu1  ;;  %v1370_v19 = vmax.f32 %v1043_v1, 0.0  ;;  %v1372_v20 = vmax.f32 %v1236_v2, 0.0 }
 0x1b7   : > { %v1047_v63 = vadd.f32 %v1046_v60, %v3819_v11  ;;  %v1240_v0 = vadd.f32 %v1239_v61, %v3821_v12  ;;  %1849 = vmatprep.mubr.bf16.mxu0 %v1447_v55  ;;  %2010 = vmatprep.mubr.bf16.mxu1 %v1449_v56  ;;  %v1371_v15 = vmax.f32 %v1045_v59, 0.0  ;;  %v1373_v16 = vmax.f32 %v1238_v62, 0.0 }
 0x1b8   : > { %v1048_v3 = vpop.f32.mrf.mxu0  ;;  %v1241_v4 = vpop.f32.mrf.mxu1  ;;  %1850 = vmatmul.mubr.bf16.gmra.mxu0 %v1446_v57  ;;  %2011 = vmatmul.mubr.bf16.gmra.mxu1 %v1448_v58 }
 0x1b9   : > { %v1049_v5 = vadd.f32 %v1048_v3, %v3815_v9  ;;  %v1242_v6 = vadd.f32 %v1241_v4, %v3817_v10  ;;  %v1374_v7 = vmax.f32 %v1047_v63, 0.0  ;;  %v1376_v8 = vmax.f32 %v1240_v0, 0.0 }
 0x1ba   : > { %v1052_v13 = vpop.f32.mrf.mxu0  ;;  %v1245_v14 = vpop.f32.mrf.mxu1 }
 0x1bb   : > { %v1375_v17 = vmax.f32 %v1049_v5, 0.0  ;;  %v1377_v18 = vmax.f32 %v1242_v6, 0.0  ;;  %v1450_v25 = vpack.c.bf16 %v1374_v7, %v1370_v19  ;;  %v1452_v26 = vpack.c.bf16 %v1376_v8, %v1372_v20 }
 0x1bc   : > { %v1054_v21 = vpop.f32.mrf.mxu0  ;;  %v1247_v22 = vpop.f32.mrf.mxu1  ;;  %v1053_v33 = vadd.f32 %v1052_v13, %v3819_v11  ;;  %v1246_v34 = vadd.f32 %v1245_v14, %v3821_v12 }
 0x1bd   : > { %v1451_v23 = vpack.c.bf16 %v1375_v17, %v1371_v15  ;;  %v1453_v24 = vpack.c.bf16 %v1377_v18, %v1373_v16  ;;  %v1055_v27 = vadd.f32 %v1054_v21, %v3815_v9  ;;  %v1248_v30 = vadd.f32 %v1247_v22, %v3817_v10 }
 0x1be   : > { %v1056_v28 = vpop.f32.mrf.mxu0  ;;  %v1249_v29 = vpop.f32.mrf.mxu1  ;;  %v1378_v47 = vmax.f32 %v1053_v33, 0.0  ;;  %v1380_v48 = vmax.f32 %v1246_v34, 0.0 }
 0x1bf   : > { %v1057_v31 = vadd.f32 %v1056_v28, %v3819_v11  ;;  %v1250_v32 = vadd.f32 %v1249_v29, %v3821_v12  ;;  %1857 = vmatprep.mubr.bf16.mxu0 %v1451_v23  ;;  %2018 = vmatprep.mubr.bf16.mxu1 %v1453_v24  ;;  %v1379_v43 = vmax.f32 %v1055_v27, 0.0  ;;  %v1381_v44 = vmax.f32 %v1248_v30, 0.0 }
 0x1c0   : > { %v1058_v35 = vpop.f32.mrf.mxu0  ;;  %v1251_v36 = vpop.f32.mrf.mxu1  ;;  %1858 = vmatmul.mubr.bf16.gmra.mxu0 %v1450_v25  ;;  %2019 = vmatmul.mubr.bf16.gmra.mxu1 %v1452_v26 }
 0x1c1   : > { %v1059_v37 = vadd.f32 %v1058_v35, %v3815_v9  ;;  %v1252_v38 = vadd.f32 %v1251_v36, %v3817_v10  ;;  %v1382_v39 = vmax.f32 %v1057_v31, 0.0  ;;  %v1384_v40 = vmax.f32 %v1250_v32, 0.0 }
 0x1c2   : > { %v1062_v41 = vpop.f32.mrf.mxu0  ;;  %v1255_v42 = vpop.f32.mrf.mxu1 }
 0x1c3   : > { %v1383_v45 = vmax.f32 %v1059_v37, 0.0  ;;  %v1385_v46 = vmax.f32 %v1252_v38, 0.0  ;;  %v1454_v53 = vpack.c.bf16 %v1382_v39, %v1378_v47  ;;  %v1456_v54 = vpack.c.bf16 %v1384_v40, %v1380_v48 }
 0x1c4   : > { %v1064_v49 = vpop.f32.mrf.mxu0  ;;  %v1257_v50 = vpop.f32.mrf.mxu1  ;;  %v1063_v61 = vadd.f32 %v1062_v41, %v3819_v11  ;;  %v1256_v62 = vadd.f32 %v1255_v42, %v3821_v12 }
 0x1c5   : > { %v1455_v51 = vpack.c.bf16 %v1383_v45, %v1379_v43  ;;  %v1457_v52 = vpack.c.bf16 %v1385_v46, %v1381_v44  ;;  %v1065_v55 = vadd.f32 %v1064_v49, %v3815_v9  ;;  %v1258_v58 = vadd.f32 %v1257_v50, %v3817_v10 }
 0x1c6   : > { %v1066_v56 = vpop.f32.mrf.mxu0  ;;  %v1259_v57 = vpop.f32.mrf.mxu1  ;;  %v1386_v15 = vmax.f32 %v1063_v61, 0.0  ;;  %v1388_v16 = vmax.f32 %v1256_v62, 0.0  ;;  %v3433_v61 = vld [vmem:[%s4201_s7 + $0x38] sm:$0xff]   ;;  %v3434_v62 = vld [vmem:[%s4201_s7 + $0x30] sm:$0xff]  }
 0x1c7   : > { %v1067_v59 = vadd.f32 %v1066_v56, %v3819_v11  ;;  %v1260_v60 = vadd.f32 %v1259_v57, %v3821_v12  ;;  %1865 = vmatprep.mubr.bf16.mxu0 %v1455_v51  ;;  %2026 = vmatprep.mubr.bf16.mxu1 %v1457_v52  ;;  %v1387_v7 = vmax.f32 %v1065_v55, 0.0  ;;  %v1389_v8 = vmax.f32 %v1258_v58, 0.0 }
 0x1c8   : > { %v1068_v63 = vpop.f32.mrf.mxu0  ;;  %v1261_v0 = vpop.f32.mrf.mxu1  ;;  %1866 = vmatmul.mubr.bf16.gmra.mxu0 %v1454_v53  ;;  %2027 = vmatmul.mubr.bf16.gmra.mxu1 %v1456_v54 }
 0x1c9   : > { %v1069_v1 = vadd.f32 %v1068_v63, %v3815_v9  ;;  %v1262_v2 = vadd.f32 %v1261_v0, %v3817_v10  ;;  %v1390_v3 = vmax.f32 %v1067_v59, 0.0  ;;  %v1392_v4 = vmax.f32 %v1260_v60, 0.0  ;;  %3185 = vmatprep.subr.bf16.mxu1 %v3433_v61 }
 0x1ca   : > { %v1072_v5 = vpop.f32.mrf.mxu0  ;;  %v1265_v6 = vpop.f32.mrf.mxu1  ;;  %3186 = vmatpush3.bf16.msra.mxu1 %v3433_v61 }
 0x1cb   : > { %v1391_v13 = vmax.f32 %v1069_v1, 0.0  ;;  %v1393_v14 = vmax.f32 %v1262_v2, 0.0  ;;  %v1458_v21 = vpack.c.bf16 %v1390_v3, %v1386_v15  ;;  %v1460_v22 = vpack.c.bf16 %v1392_v4, %v1388_v16  ;;  %3187 = vmatprep.subr.bf16.mxu1 %v3434_v62 }
 0x1cc   : > { %v1074_v17 = vpop.f32.mrf.mxu0  ;;  %v1267_v18 = vpop.f32.mrf.mxu1  ;;  %v1073_v29 = vadd.f32 %v1072_v5, %v3819_v11  ;;  %v1266_v30 = vadd.f32 %v1265_v6, %v3821_v12 }
 0x1cd   : > { %v1459_v19 = vpack.c.bf16 %v1391_v13, %v1387_v7  ;;  %v1461_v20 = vpack.c.bf16 %v1393_v14, %v1389_v8  ;;  %v1075_v23 = vadd.f32 %v1074_v17, %v3815_v9  ;;  %v1268_v26 = vadd.f32 %v1267_v18, %v3817_v10  ;;  %v3435_v8 = vld [vmem:[%s4201_s7 + $0x28] sm:$0xff]  }
 0x1ce   : > { %v1076_v24 = vpop.f32.mrf.mxu0  ;;  %v1269_v25 = vpop.f32.mrf.mxu1  ;;  %v1394_v41 = vmax.f32 %v1073_v29, 0.0  ;;  %v1396_v42 = vmax.f32 %v1266_v30, 0.0  ;;  %3188 = vmatpush3.bf16.msra.mxu1 %v3434_v62 }
 0x1cf   : > { %v1077_v27 = vadd.f32 %v1076_v24, %v3819_v11  ;;  %v1270_v28 = vadd.f32 %v1269_v25, %v3821_v12  ;;  %1873 = vmatprep.mubr.bf16.mxu0 %v1459_v19  ;;  %2034 = vmatprep.mubr.bf16.mxu1 %v1461_v20  ;;  %v1395_v37 = vmax.f32 %v1075_v23, 0.0  ;;  %v1397_v38 = vmax.f32 %v1268_v26, 0.0  ;;  %v3436_v23 = vld [vmem:[%s4201_s7 + $0x20] sm:$0xff]  }
 0x1d0   : > { %v1078_v31 = vpop.f32.mrf.mxu0  ;;  %v1271_v32 = vpop.f32.mrf.mxu1  ;;  %1874 = vmatmul.mubr.bf16.gmra.mxu0 %v1458_v21  ;;  %2035 = vmatmul.mubr.bf16.gmra.mxu1 %v1460_v22 }
 0x1d1   : > { %v1079_v33 = vadd.f32 %v1078_v31, %v3815_v9  ;;  %v1272_v34 = vadd.f32 %v1271_v32, %v3817_v10  ;;  %v1398_v35 = vmax.f32 %v1077_v27, 0.0  ;;  %v1400_v36 = vmax.f32 %v1270_v28, 0.0  ;;  %v3978_v10 = vld [vmem:[%s4198_s4] ss:$0 sm:$0xff]  ;;  %3189 = vmatprep.subr.bf16.mxu1 %v3435_v8 }
 0x1d2   : > { %3190 = vmatpush3.bf16.msra.mxu1 %v3435_v8 }
 0x1d3   : > { %v1399_v39 = vmax.f32 %v1079_v33, 0.0  ;;  %v1401_v40 = vmax.f32 %v1272_v34, 0.0  ;;  %v1462_v44 = vpack.c.bf16 %v1398_v35, %v1394_v41  ;;  %v1464_v12 = vpack.c.bf16 %v1400_v36, %v1396_v42  ;;  %3191 = vmatprep.subr.bf16.mxu1 %v3436_v23  ;;  %v3437_v33 = vld [vmem:[%s4201_s7 + $0x18] sm:$0xff]  }
 0x1d5   : > { %v1463_v43 = vpack.c.bf16 %v1399_v39, %v1395_v37  ;;  %v1465_v11 = vpack.c.bf16 %v1401_v40, %v1397_v38 }
 0x1d6   : > { %3192 = vmatpush3.bf16.msra.mxu1 %v3436_v23 }
 0x1d7   : > { %1881 = vmatprep.mubr.bf16.mxu0 %v1463_v43  ;;  %2042 = vmatprep.mubr.bf16.mxu1 %v1465_v11 }
 0x1d8   : > { %1882 = vmatmul.mubr.bf16.gmra.mxu0 %v1462_v44  ;;  %2043 = vmatmul.mubr.bf16.gmra.mxu1 %v1464_v12 }
 0x1d9   : > { %3193 = vmatprep.subr.bf16.mxu1 %v3437_v33 }
 0x1da   : > { %3194 = vmatpush3.bf16.msra.mxu1 %v3437_v33 }
 0x220   : > { %v2881_v45 = vpop.f32.mrf.mxu0  ;;  %v2993_v9 = vpop.f32.mrf.mxu1 }
 0x222   : > { %v2882_v46 = vpop.f32.mrf.mxu0  ;;  %v2994_v47 = vpop.f32.mrf.mxu1 }
 0x223   : > { %v2883_v48 = vadd.f32 %v2882_v46, %v2881_v45  ;;  %v2995_v54 = vadd.f32 %v2994_v47, %v2993_v9 }
 0x224   : > { %v2884_v49 = vpop.f32.mrf.mxu0  ;;  %v2996_v50 = vpop.f32.mrf.mxu1 }
 0x225   : > { %v1764_v51 = vadd.f32 %v2883_v48, %v3978_v10 }
 0x226   : > { %v2885_v52 = vpop.f32.mrf.mxu0  ;;  %v2997_v53 = vpop.f32.mrf.mxu1 }
 0x227   : > { %v2886_v55 = vadd.f32 %v2885_v52, %v2884_v49  ;;  %v1925_v58 = vadd.f32 %v2995_v54, %v1764_v51  ;;  %v2998_v60 = vadd.f32 %v2997_v53, %v2996_v50 }
 0x228   : > { %v2887_v56 = vpop.f32.mrf.mxu0  ;;  %v2999_v57 = vpop.f32.mrf.mxu1 }
 0x229   : > { %v1767_v59 = vadd.f32 %v2886_v55, %v3978_v10  ;;  %v2051_v5 = vmax.f32 %v1925_v58, 0.0 }
 0x22a   : > { %v2888_v63 = vpop.f32.mrf.mxu0  ;;  %v3000_v0 = vpop.f32.mrf.mxu1 }
 0x22b   : > { %v1928_v1 = vadd.f32 %v2998_v60, %v1767_v59  ;;  %v2889_v2 = vadd.f32 %v2888_v63, %v2887_v56  ;;  %v3001_v15 = vadd.f32 %v3000_v0, %v2999_v57 }
 0x22c   : > { %v2890_v3 = vpop.f32.mrf.mxu0  ;;  %v3002_v4 = vpop.f32.mrf.mxu1 }
 0x22d   : > { %v2052_v6 = vmax.f32 %v1928_v1, 0.0  ;;  %v1772_v7 = vadd.f32 %v2889_v2, %v3978_v10 }
 0x22e   : > { %v2891_v13 = vpop.f32.mrf.mxu0  ;;  %v3003_v14 = vpop.f32.mrf.mxu1 }
 0x22f   : > { %v2892_v16 = vadd.f32 %v2891_v13, %v2890_v3  ;;  %v2083_v17 = vpack.c.bf16 %v2052_v6, %v2051_v5  ;;  %v1933_v20 = vadd.f32 %v3001_v15, %v1772_v7  ;;  %v3004_v22 = vadd.f32 %v3003_v14, %v3002_v4 }
 0x230   : > { %v2893_v18 = vpop.f32.mrf.mxu0  ;;  %v3005_v19 = vpop.f32.mrf.mxu1 }
 0x231   : > { %v1775_v21 = vadd.f32 %v2892_v16, %v3978_v10  ;;  %3153 = vmatprep.mubr.bf16.mxu0 %v2083_v17  ;;  %v2053_v30 = vmax.f32 %v1933_v20, 0.0 }
 0x232   : > { %v2894_v24 = vpop.f32.mrf.mxu0  ;;  %v3006_v25 = vpop.f32.mrf.mxu1 }
 0x233   : > { %v1936_v26 = vadd.f32 %v3004_v22, %v1775_v21  ;;  %v2895_v27 = vadd.f32 %v2894_v24, %v2893_v18  ;;  %v3007_v37 = vadd.f32 %v3006_v25, %v3005_v19 }
 0x234   : > { %v2896_v28 = vpop.f32.mrf.mxu0  ;;  %v3008_v29 = vpop.f32.mrf.mxu1 }
 0x235   : > { %v2054_v31 = vmax.f32 %v1936_v26, 0.0  ;;  %v1780_v32 = vadd.f32 %v2895_v27, %v3978_v10 }
 0x236   : > { %v2897_v34 = vpop.f32.mrf.mxu0  ;;  %v3009_v35 = vpop.f32.mrf.mxu1 }
 0x237   : > { %v2084_v36 = vpack.c.bf16 %v2054_v31, %v2053_v30  ;;  %v2898_v38 = vadd.f32 %v2897_v34, %v2896_v28  ;;  %v1941_v41 = vadd.f32 %v3007_v37, %v1780_v32  ;;  %v3010_v43 = vadd.f32 %v3009_v35, %v3008_v29 }
 0x238   : > { %v2899_v39 = vpop.f32.mrf.mxu0  ;;  %v3011_v40 = vpop.f32.mrf.mxu1 }
 0x239   : > { %v1783_v42 = vadd.f32 %v2898_v38, %v3978_v10  ;;  %3154 = vmatmul.mubr.bf16.vlgmr.msra.gmra.mxu0 %v2084_v36  ;;  %v2055_v47 = vmax.f32 %v1941_v41, 0.0 }
 0x23a   : > { %v2900_v11 = vpop.f32.mrf.mxu0  ;;  %v3012_v44 = vpop.f32.mrf.mxu1 }
 0x23b   : > { %v1944_v12 = vadd.f32 %v3010_v43, %v1783_v42  ;;  %v2901_v45 = vadd.f32 %v2900_v11, %v2899_v39  ;;  %v3013_v52 = vadd.f32 %v3012_v44, %v3011_v40 }
 0x23c   : > { %v2902_v9 = vpop.f32.mrf.mxu0  ;;  %v3014_v46 = vpop.f32.mrf.mxu1 }
 0x23d   : > { %v2056_v48 = vmax.f32 %v1944_v12, 0.0  ;;  %v1788_v49 = vadd.f32 %v2901_v45, %v3978_v10 }
 0x23e   : > { %v2903_v50 = vpop.f32.mrf.mxu0  ;;  %v3015_v51 = vpop.f32.mrf.mxu1 }
 0x23f   : > { %v2904_v53 = vadd.f32 %v2903_v50, %v2902_v9  ;;  %v2085_v54 = vpack.c.bf16 %v2056_v48, %v2055_v47  ;;  %v1949_v57 = vadd.f32 %v3013_v52, %v1788_v49  ;;  %v3016_v59 = vadd.f32 %v3015_v51, %v3014_v46 }
 0x240   : > { %v2905_v55 = vpop.f32.mrf.mxu0  ;;  %v3017_v56 = vpop.f32.mrf.mxu1 }
 0x241   : > { %v1791_v58 = vadd.f32 %v2904_v53, %v3978_v10  ;;  %3157 = vmatprep.mubr.bf16.mxu0 %v2085_v54  ;;  %v2057_v2 = vmax.f32 %v1949_v57, 0.0 }
 0x242   : > { %v2906_v60 = vpop.f32.mrf.mxu0  ;;  %v3018_v61 = vpop.f32.mrf.mxu1 }
 0x243   : > { %v1952_v62 = vadd.f32 %v3016_v59, %v1791_v58  ;;  %v2907_v63 = vadd.f32 %v2906_v60, %v2905_v55  ;;  %v3019_v8 = vadd.f32 %v3018_v61, %v3017_v56 }
 0x244   : > { %v2908_v0 = vpop.f32.mrf.mxu0  ;;  %v3020_v1 = vpop.f32.mrf.mxu1 }
 0x245   : > { %v2058_v3 = vmax.f32 %v1952_v62, 0.0  ;;  %v1796_v4 = vadd.f32 %v2907_v63, %v3978_v10 }
 0x246   : > { %v2909_v5 = vpop.f32.mrf.mxu0  ;;  %v3021_v6 = vpop.f32.mrf.mxu1 }
 0x247   : > { %v2086_v7 = vpack.c.bf16 %v2058_v3, %v2057_v2  ;;  %v2910_v13 = vadd.f32 %v2909_v5, %v2908_v0  ;;  %v1957_v16 = vadd.f32 %v3019_v8, %v1796_v4  ;;  %v3022_v18 = vadd.f32 %v3021_v6, %v3020_v1 }
 0x248   : > { %v2911_v14 = vpop.f32.mrf.mxu0  ;;  %v3023_v15 = vpop.f32.mrf.mxu1 }
 0x249   : > { %v1799_v17 = vadd.f32 %v2910_v13, %v3978_v10  ;;  %3158 = vmatmul.mubr.bf16.gmra.mxu0 %v2086_v7  ;;  %v2059_v25 = vmax.f32 %v1957_v16, 0.0 }
 0x24a   : > { %v2912_v19 = vpop.f32.mrf.mxu0  ;;  %v3024_v20 = vpop.f32.mrf.mxu1 }
 0x24b   : > { %v1960_v21 = vadd.f32 %v3022_v18, %v1799_v17  ;;  %v2913_v22 = vadd.f32 %v2912_v19, %v2911_v14  ;;  %v3025_v30 = vadd.f32 %v3024_v20, %v3023_v15 }
 0x24c   : > { %v2914_v23 = vpop.f32.mrf.mxu0  ;;  %v3026_v24 = vpop.f32.mrf.mxu1 }
 0x24d   : > { %v2060_v26 = vmax.f32 %v1960_v21, 0.0  ;;  %v1804_v27 = vadd.f32 %v2913_v22, %v3978_v10 }
 0x24e   : > { %v2915_v28 = vpop.f32.mrf.mxu0  ;;  %v3027_v29 = vpop.f32.mrf.mxu1 }
 0x24f   : > { %v2916_v31 = vadd.f32 %v2915_v28, %v2914_v23  ;;  %v2087_v32 = vpack.c.bf16 %v2060_v26, %v2059_v25  ;;  %v1965_v35 = vadd.f32 %v3025_v30, %v1804_v27  ;;  %v3028_v37 = vadd.f32 %v3027_v29, %v3026_v24 }
 0x250   : > { %v2917_v33 = vpop.f32.mrf.mxu0  ;;  %v3029_v34 = vpop.f32.mrf.mxu1 }
 0x251   : > { %v1807_v36 = vadd.f32 %v2916_v31, %v3978_v10  ;;  %3161 = vmatprep.mubr.bf16.mxu0 %v2087_v32  ;;  %v2061_v11 = vmax.f32 %v1965_v35, 0.0 }
 0x252   : > { %v2918_v38 = vpop.f32.mrf.mxu0  ;;  %v3030_v39 = vpop.f32.mrf.mxu1 }
 0x253   : > { %v1968_v40 = vadd.f32 %v3028_v37, %v1807_v36  ;;  %v2919_v41 = vadd.f32 %v2918_v38, %v2917_v33  ;;  %v3031_v47 = vadd.f32 %v3030_v39, %v3029_v34 }
 0x254   : > { %v2920_v42 = vpop.f32.mrf.mxu0  ;;  %v3032_v43 = vpop.f32.mrf.mxu1 }
 0x255   : > { %v2062_v44 = vmax.f32 %v1968_v40, 0.0  ;;  %v1812_v12 = vadd.f32 %v2919_v41, %v3978_v10 }
 0x256   : > { %v2921_v45 = vpop.f32.mrf.mxu0  ;;  %v3033_v9 = vpop.f32.mrf.mxu1 }
 0x257   : > { %v2088_v46 = vpack.c.bf16 %v2062_v44, %v2061_v11  ;;  %v2922_v48 = vadd.f32 %v2921_v45, %v2920_v42  ;;  %v1973_v51 = vadd.f32 %v3031_v47, %v1812_v12  ;;  %v3034_v53 = vadd.f32 %v3033_v9, %v3032_v43 }
 0x258   : > { %v2923_v49 = vpop.f32.mrf.mxu0  ;;  %v3035_v50 = vpop.f32.mrf.mxu1 }
 0x259   : > { %v1815_v52 = vadd.f32 %v2922_v48, %v3978_v10  ;;  %3162 = vmatmul.mubr.bf16.gmra.mxu0 %v2088_v46  ;;  %v2063_v60 = vmax.f32 %v1973_v51, 0.0 }
 0x25a   : > { %v2924_v54 = vpop.f32.mrf.mxu0  ;;  %v3036_v55 = vpop.f32.mrf.mxu1 }
 0x25b   : > { %v1976_v56 = vadd.f32 %v3034_v53, %v1815_v52  ;;  %v2925_v57 = vadd.f32 %v2924_v54, %v2923_v49  ;;  %v3037_v1 = vadd.f32 %v3036_v55, %v3035_v50 }
 0x25c   : > { %v2926_v58 = vpop.f32.mrf.mxu0  ;;  %v3038_v59 = vpop.f32.mrf.mxu1 }
 0x25d   : > { %v2064_v61 = vmax.f32 %v1976_v56, 0.0  ;;  %v1820_v62 = vadd.f32 %v2925_v57, %v3978_v10 }
 0x25e   : > { %v2927_v63 = vpop.f32.mrf.mxu0  ;;  %v3039_v0 = vpop.f32.mrf.mxu1 }
 0x25f   : > { %v2928_v2 = vadd.f32 %v2927_v63, %v2926_v58  ;;  %v2089_v3 = vpack.c.bf16 %v2064_v61, %v2063_v60  ;;  %v1981_v6 = vadd.f32 %v3037_v1, %v1820_v62  ;;  %v3040_v8 = vadd.f32 %v3039_v0, %v3038_v59 }
 0x260   : > { %v2929_v4 = vpop.f32.mrf.mxu0  ;;  %v3041_v5 = vpop.f32.mrf.mxu1 }
 0x261   : > { %v1823_v7 = vadd.f32 %v2928_v2, %v3978_v10  ;;  %3165 = vmatprep.mubr.bf16.mxu0 %v2089_v3  ;;  %v2065_v19 = vmax.f32 %v1981_v6, 0.0 }
 0x262   : > { %v2930_v13 = vpop.f32.mrf.mxu0  ;;  %v3042_v14 = vpop.f32.mrf.mxu1 }
 0x263   : > { %v1984_v15 = vadd.f32 %v3040_v8, %v1823_v7  ;;  %v2931_v16 = vadd.f32 %v2930_v13, %v2929_v4  ;;  %v3043_v25 = vadd.f32 %v3042_v14, %v3041_v5  ;;  %v3438_v5 = vld [vmem:[%s4201_s7 + $0x10] sm:$0xff]  }
 0x264   : > { %v2932_v17 = vpop.f32.mrf.mxu0  ;;  %v3044_v18 = vpop.f32.mrf.mxu1  ;;  %3195 = vmatprep.subr.bf16.mxu1 %v3438_v5 }
 0x265   : > { %v2066_v20 = vmax.f32 %v1984_v15, 0.0  ;;  %v1828_v21 = vadd.f32 %v2931_v16, %v3978_v10  ;;  %3196 = vmatpush3.bf16.msra.mxu1 %v3438_v5 }
 0x266   : > { %v2933_v22 = vpop.f32.mrf.mxu0  ;;  %v3045_v23 = vpop.f32.mrf.mxu1 }
 0x267   : > { %v2090_v24 = vpack.c.bf16 %v2066_v20, %v2065_v19  ;;  %v2934_v26 = vadd.f32 %v2933_v22, %v2932_v17  ;;  %v1989_v29 = vadd.f32 %v3043_v25, %v1828_v21  ;;  %v3046_v31 = vadd.f32 %v3045_v23, %v3044_v18  ;;  %v3439_v19 = vld [vmem:[%s4201_s7 + $0x8] sm:$0xff]  }
 0x268   : > { %v2935_v27 = vpop.f32.mrf.mxu0  ;;  %v3047_v28 = vpop.f32.mrf.mxu1  ;;  %3197 = vmatprep.subr.bf16.mxu1 %v3439_v19 }
 0x269   : > { %v1831_v30 = vadd.f32 %v2934_v26, %v3978_v10  ;;  %3166 = vmatmul.mubr.bf16.gmra.mxu0 %v2090_v24  ;;  %v2067_v38 = vmax.f32 %v1989_v29, 0.0  ;;  %3198 = vmatpush3.bf16.msra.mxu1 %v3439_v19 }
 0x26a   : > { %v2936_v32 = vpop.f32.mrf.mxu0  ;;  %v3048_v33 = vpop.f32.mrf.mxu1 }
 0x26b   : > { %v1992_v34 = vadd.f32 %v3046_v31, %v1831_v30  ;;  %v2937_v35 = vadd.f32 %v2936_v32, %v2935_v27  ;;  %v3049_v43 = vadd.f32 %v3048_v33, %v3047_v28  ;;  %v3440_v30 = vld [vmem:[%s4201_s7] sm:$0xff]  }
 0x26c   : > { %v2938_v36 = vpop.f32.mrf.mxu0  ;;  %v3050_v37 = vpop.f32.mrf.mxu1  ;;  %3199 = vmatprep.subr.bf16.mxu1 %v3440_v30 }
 0x26d   : > { %v2068_v39 = vmax.f32 %v1992_v34, 0.0  ;;  %v1836_v40 = vadd.f32 %v2937_v35, %v3978_v10  ;;  %3200 = vmatpush3.bf16.msra.mxu1 %v3440_v30 }
 0x26e   : > { %v2939_v41 = vpop.f32.mrf.mxu0  ;;  %v3051_v42 = vpop.f32.mrf.mxu1 }
 0x26f   : > { %v2940_v11 = vadd.f32 %v2939_v41, %v2938_v36  ;;  %v2091_v44 = vpack.c.bf16 %v2068_v39, %v2067_v38  ;;  %v1997_v9 = vadd.f32 %v3049_v43, %v1836_v40  ;;  %v3052_v47 = vadd.f32 %v3051_v42, %v3050_v37 }
 0x270   : > { %v2941_v12 = vpop.f32.mrf.mxu0  ;;  %v3053_v45 = vpop.f32.mrf.mxu1 }
 0x271   : > { %v1839_v46 = vadd.f32 %v2940_v11, %v3978_v10  ;;  %3169 = vmatprep.mubr.bf16.mxu0 %v2091_v44  ;;  %v2069_v54 = vmax.f32 %v1997_v9, 0.0 }
 0x272   : > { %v2942_v48 = vpop.f32.mrf.mxu0  ;;  %v3054_v49 = vpop.f32.mrf.mxu1 }
 0x273   : > { %v2000_v50 = vadd.f32 %v3052_v47, %v1839_v46  ;;  %v2943_v51 = vadd.f32 %v2942_v48, %v2941_v12  ;;  %v3055_v60 = vadd.f32 %v3054_v49, %v3053_v45 }
 0x274   : > { %v2944_v52 = vpop.f32.mrf.mxu0  ;;  %v3056_v53 = vpop.f32.mrf.mxu1 }
 0x275   : > { %v2070_v55 = vmax.f32 %v2000_v50, 0.0  ;;  %v1844_v56 = vadd.f32 %v2943_v51, %v3978_v10 }
 0x276   : > { %v2945_v57 = vpop.f32.mrf.mxu0  ;;  %v3057_v58 = vpop.f32.mrf.mxu1 }
 0x277   : > { %v2092_v59 = vpack.c.bf16 %v2070_v55, %v2069_v54  ;;  %v2946_v61 = vadd.f32 %v2945_v57, %v2944_v52  ;;  %v2005_v0 = vadd.f32 %v3055_v60, %v1844_v56  ;;  %v3058_v2 = vadd.f32 %v3057_v58, %v3056_v53 }
 0x278   : > { %v2947_v62 = vpop.f32.mrf.mxu0  ;;  %v3059_v63 = vpop.f32.mrf.mxu1 }
 0x279   : > { %v1847_v1 = vadd.f32 %v2946_v61, %v3978_v10  ;;  %3170 = vmatmul.mubr.bf16.gmra.mxu0 %v2092_v59  ;;  %v2071_v14 = vmax.f32 %v2005_v0, 0.0 }
 0x27a   : > { %v2948_v3 = vpop.f32.mrf.mxu0  ;;  %v3060_v4 = vpop.f32.mrf.mxu1 }
 0x27b   : > { %v2008_v6 = vadd.f32 %v3058_v2, %v1847_v1  ;;  %v2949_v7 = vadd.f32 %v2948_v3, %v2947_v62  ;;  %v3061_v20 = vadd.f32 %v3060_v4, %v3059_v63 }
 0x27c   : > { %v2950_v8 = vpop.f32.mrf.mxu0  ;;  %v3062_v13 = vpop.f32.mrf.mxu1 }
 0x27d   : > { %v2072_v15 = vmax.f32 %v2008_v6, 0.0  ;;  %v1852_v16 = vadd.f32 %v2949_v7, %v3978_v10 }
 0x27e   : > { %v2951_v17 = vpop.f32.mrf.mxu0  ;;  %v3063_v18 = vpop.f32.mrf.mxu1 }
 0x27f   : > { %v2952_v21 = vadd.f32 %v2951_v17, %v2950_v8  ;;  %v2093_v22 = vpack.c.bf16 %v2072_v15, %v2071_v14  ;;  %v2013_v25 = vadd.f32 %v3061_v20, %v1852_v16  ;;  %v3064_v27 = vadd.f32 %v3063_v18, %v3062_v13 }
 0x280   : > { %v2953_v23 = vpop.f32.mrf.mxu0  ;;  %v3065_v24 = vpop.f32.mrf.mxu1 }
 0x281   : > { %v1855_v26 = vadd.f32 %v2952_v21, %v3978_v10  ;;  %3173 = vmatprep.mubr.bf16.mxu0 %v2093_v22  ;;  %v2073_v35 = vmax.f32 %v2013_v25, 0.0 }
 0x282   : > { %v2954_v28 = vpop.f32.mrf.mxu0  ;;  %v3066_v29 = vpop.f32.mrf.mxu1 }
 0x283   : > { %v2016_v31 = vadd.f32 %v3064_v27, %v1855_v26  ;;  %v2955_v32 = vadd.f32 %v2954_v28, %v2953_v23  ;;  %v3067_v41 = vadd.f32 %v3066_v29, %v3065_v24 }
 0x284   : > { %v2956_v33 = vpop.f32.mrf.mxu0  ;;  %v3068_v34 = vpop.f32.mrf.mxu1 }
 0x285   : > { %v2074_v36 = vmax.f32 %v2016_v31, 0.0  ;;  %v1860_v37 = vadd.f32 %v2955_v32, %v3978_v10 }
 0x286   : > { %v2957_v38 = vpop.f32.mrf.mxu0  ;;  %v3069_v39 = vpop.f32.mrf.mxu1 }
 0x287   : > { %v2094_v40 = vpack.c.bf16 %v2074_v36, %v2073_v35  ;;  %v2958_v42 = vadd.f32 %v2957_v38, %v2956_v33  ;;  %v2021_v44 = vadd.f32 %v3067_v41, %v1860_v37  ;;  %v3070_v45 = vadd.f32 %v3069_v39, %v3068_v34 }
 0x288   : > { %v2959_v43 = vpop.f32.mrf.mxu0  ;;  %v3071_v11 = vpop.f32.mrf.mxu1 }
 0x289   : > { %v1863_v12 = vadd.f32 %v2958_v42, %v3978_v10  ;;  %3174 = vmatmul.mubr.bf16.gmra.mxu0 %v2094_v40  ;;  %v2075_v51 = vmax.f32 %v2021_v44, 0.0 }
 0x28a   : > { %v2960_v9 = vpop.f32.mrf.mxu0  ;;  %v3072_v46 = vpop.f32.mrf.mxu1 }
 0x28b   : > { %v2024_v47 = vadd.f32 %v3070_v45, %v1863_v12  ;;  %v2961_v48 = vadd.f32 %v2960_v9, %v2959_v43  ;;  %v3073_v56 = vadd.f32 %v3072_v46, %v3071_v11  ;;  %v4039_v12 = vld [vmem:[%s4200_s6] ss:$0 sm:$0xff] }
 0x28c   : > { %v2962_v49 = vpop.f32.mrf.mxu0  ;;  %v3074_v50 = vpop.f32.mrf.mxu1 }
 0x28d   : > { %v2076_v52 = vmax.f32 %v2024_v47, 0.0  ;;  %v1868_v53 = vadd.f32 %v2961_v48, %v3978_v10 }
 0x28e   : > { %v2963_v54 = vpop.f32.mrf.mxu0  ;;  %v3075_v55 = vpop.f32.mrf.mxu1 }
 0x28f   : > { %v2964_v57 = vadd.f32 %v2963_v54, %v2962_v49  ;;  %v2095_v58 = vpack.c.bf16 %v2076_v52, %v2075_v51  ;;  %v2029_v61 = vadd.f32 %v3073_v56, %v1868_v53  ;;  %v3076_v63 = vadd.f32 %v3075_v55, %v3074_v50 }
 0x290   : > { %v2965_v59 = vpop.f32.mrf.mxu0  ;;  %v3077_v60 = vpop.f32.mrf.mxu1 }
 0x291   : > { %v1871_v62 = vadd.f32 %v2964_v57, %v3978_v10  ;;  %3177 = vmatprep.mubr.bf16.mxu0 %v2095_v58  ;;  %v2077_v6 = vmax.f32 %v2029_v61, 0.0 }
 0x292   : > { %v2966_v0 = vpop.f32.mrf.mxu0  ;;  %v3078_v1 = vpop.f32.mrf.mxu1 }
 0x293   : > { %v2032_v2 = vadd.f32 %v3076_v63, %v1871_v62  ;;  %v2967_v3 = vadd.f32 %v2966_v0, %v2965_v59  ;;  %v3079_v16 = vadd.f32 %v3078_v1, %v3077_v60 }
 0x294   : > { %v2968_v4 = vpop.f32.mrf.mxu0  ;;  %v3080_v5 = vpop.f32.mrf.mxu1 }
 0x295   : > { %v2078_v7 = vmax.f32 %v2032_v2, 0.0  ;;  %v1876_v8 = vadd.f32 %v2967_v3, %v3978_v10 }
 0x296   : > { %v2969_v13 = vpop.f32.mrf.mxu0  ;;  %v3081_v14 = vpop.f32.mrf.mxu1 }
 0x297   : > { %v2096_v15 = vpack.c.bf16 %v2078_v7, %v2077_v6  ;;  %v2970_v17 = vadd.f32 %v2969_v13, %v2968_v4  ;;  %v2037_v20 = vadd.f32 %v3079_v16, %v1876_v8  ;;  %v3082_v22 = vadd.f32 %v3081_v14, %v3080_v5 }
 0x298   : > { %v2971_v18 = vpop.f32.mrf.mxu0  ;;  %v3083_v19 = vpop.f32.mrf.mxu1 }
 0x299   : > { %v1879_v21 = vadd.f32 %v2970_v17, %v3978_v10  ;;  %3178 = vmatmul.mubr.bf16.gmra.mxu0 %v2096_v15  ;;  %v2079_v29 = vmax.f32 %v2037_v20, 0.0 }
 0x29a   : > { %v2972_v23 = vpop.f32.mrf.mxu0  ;;  %v3084_v24 = vpop.f32.mrf.mxu1 }
 0x29b   : > { %v2040_v25 = vadd.f32 %v3082_v22, %v1879_v21  ;;  %v2973_v26 = vadd.f32 %v2972_v23, %v2971_v18  ;;  %v3085_v34 = vadd.f32 %v3084_v24, %v3083_v19 }
 0x29c   : > { %v2974_v27 = vpop.f32.mrf.mxu0  ;;  %v3086_v28 = vpop.f32.mrf.mxu1 }
 0x29d   : > { %v2080_v30 = vmax.f32 %v2040_v25, 0.0  ;;  %v1884_v31 = vadd.f32 %v2973_v26, %v3978_v10 }
 0x29e   : > { %v2975_v32 = vpop.f32.mrf.mxu0  ;;  %v3087_v33 = vpop.f32.mrf.mxu1 }
 0x29f   : > { %v2976_v35 = vadd.f32 %v2975_v32, %v2974_v27  ;;  %v2097_v36 = vpack.c.bf16 %v2080_v30, %v2079_v29  ;;  %v2045_v37 = vadd.f32 %v3085_v34, %v1884_v31  ;;  %v3088_v39 = vadd.f32 %v3087_v33, %v3086_v28 }
 0x2a1   : > { %v1887_v38 = vadd.f32 %v2976_v35, %v3978_v10  ;;  %3181 = vmatprep.mubr.bf16.mxu0 %v2097_v36  ;;  %v2081_v41 = vmax.f32 %v2045_v37, 0.0 }
 0x2a3   : > { %v2048_v40 = vadd.f32 %v3088_v39, %v1887_v38 }
 0x2a5   : > { %v2082_v42 = vmax.f32 %v2048_v40, 0.0 }
 0x2a7   : > { %v2098_v43 = vpack.c.bf16 %v2082_v42, %v2081_v41 }
 0x2a9   : > { %3182 = vmatmul.mubr.bf16.gmra.mxu0 %v2098_v43 }
 0x2f9   : > { %v3155_v11 = vpop.f32.mrf.mxu0 }
 0x2fa   : > { %v2213_v10 = vadd.f32 %v3155_v11, %v4039_v12 }
 0x2fb   : > { %v2204_v44 = vpop.f32.mrf.mxu0 }
 0x2fc   : > { %v2205_v9 = vadd.f32 %v4039_v12, %v2204_v44  ;;  %v2333_v52 = vmax.f32 %v2213_v10, 0.0 }
 0x2fd   : > { %v3156_v45 = vpop.f32.mrf.mxu0 }
 0x2fe   : > { %v2216_v46 = vadd.f32 %v3156_v45, %v4039_v12  ;;  %v2331_v50 = vmax.f32 %v2205_v9, 0.0 }
 0x2ff   : > { %v2207_v47 = vpop.f32.mrf.mxu0 }
 0x300   : > { %v2208_v48 = vadd.f32 %v4039_v12, %v2207_v47  ;;  %v2334_v49 = vmax.f32 %v2216_v46, 0.0 }
 0x302   : > { %v2332_v51 = vmax.f32 %v2208_v48, 0.0  ;;  %v2364_v54 = vpack.c.bf16 %v2334_v49, %v2333_v52 }
 0x304   : > { %v2363_v53 = vpack.c.bf16 %v2332_v51, %v2331_v50 }
 0x306   : > { %3201 = vmatprep.mubr.bf16.mxu1 %v2363_v53 }
 0x307   : > { %3202 = vmatmul.mubr.bf16.vlgmr.msra.gmra.mxu1 %v2364_v54 }
 0x309   : > { %v3159_v55 = vpop.f32.mrf.mxu0 }
 0x30a   : > { %v2229_v60 = vadd.f32 %v3159_v55, %v4039_v12 }
 0x30b   : > { %v2220_v56 = vpop.f32.mrf.mxu0 }
 0x30c   : > { %v2221_v58 = vadd.f32 %v4039_v12, %v2220_v56  ;;  %v2337_v2 = vmax.f32 %v2229_v60, 0.0 }
 0x30d   : > { %v3160_v57 = vpop.f32.mrf.mxu0 }
 0x30e   : > { %v2232_v59 = vadd.f32 %v3160_v57, %v4039_v12  ;;  %v2335_v0 = vmax.f32 %v2221_v58, 0.0 }
 0x30f   : > { %v2223_v61 = vpop.f32.mrf.mxu0 }
 0x310   : > { %v2224_v62 = vadd.f32 %v4039_v12, %v2223_v61  ;;  %v2338_v63 = vmax.f32 %v2232_v59, 0.0 }
 0x312   : > { %v2336_v1 = vmax.f32 %v2224_v62, 0.0  ;;  %v2366_v4 = vpack.c.bf16 %v2338_v63, %v2337_v2 }
 0x314   : > { %v2365_v3 = vpack.c.bf16 %v2336_v1, %v2335_v0 }
 0x316   : > { %3205 = vmatprep.mubr.bf16.mxu1 %v2365_v3 }
 0x317   : > { %3206 = vmatmul.mubr.bf16.gmra.mxu1 %v2366_v4 }
 0x319   : > { %v3163_v5 = vpop.f32.mrf.mxu0 }
 0x31a   : > { %v2245_v14 = vadd.f32 %v3163_v5, %v4039_v12 }
 0x31b   : > { %v2236_v6 = vpop.f32.mrf.mxu0 }
 0x31c   : > { %v2237_v8 = vadd.f32 %v4039_v12, %v2236_v6  ;;  %v2341_v20 = vmax.f32 %v2245_v14, 0.0 }
 0x31d   : > { %v3164_v7 = vpop.f32.mrf.mxu0 }
 0x31e   : > { %v2248_v13 = vadd.f32 %v3164_v7, %v4039_v12  ;;  %v2339_v18 = vmax.f32 %v2237_v8, 0.0 }
 0x31f   : > { %v2239_v15 = vpop.f32.mrf.mxu0 }
 0x320   : > { %v2240_v16 = vadd.f32 %v4039_v12, %v2239_v15  ;;  %v2342_v17 = vmax.f32 %v2248_v13, 0.0 }
 0x322   : > { %v2340_v19 = vmax.f32 %v2240_v16, 0.0  ;;  %v2368_v22 = vpack.c.bf16 %v2342_v17, %v2341_v20 }
 0x324   : > { %v2367_v21 = vpack.c.bf16 %v2340_v19, %v2339_v18 }
 0x326   : > { %3209 = vmatprep.mubr.bf16.mxu1 %v2367_v21 }
 0x327   : > { %3210 = vmatmul.mubr.bf16.gmra.mxu1 %v2368_v22 }
 0x329   : > { %v3167_v23 = vpop.f32.mrf.mxu0 }
 0x32a   : > { %v2261_v28 = vadd.f32 %v3167_v23, %v4039_v12 }
 0x32b   : > { %v2252_v24 = vpop.f32.mrf.mxu0 }
 0x32c   : > { %v2253_v26 = vadd.f32 %v4039_v12, %v2252_v24  ;;  %v2345_v34 = vmax.f32 %v2261_v28, 0.0 }
 0x32d   : > { %v3168_v25 = vpop.f32.mrf.mxu0 }
 0x32e   : > { %v2264_v27 = vadd.f32 %v3168_v25, %v4039_v12  ;;  %v2343_v32 = vmax.f32 %v2253_v26, 0.0 }
 0x32f   : > { %v2255_v29 = vpop.f32.mrf.mxu0 }
 0x330   : > { %v2256_v30 = vadd.f32 %v4039_v12, %v2255_v29  ;;  %v2346_v31 = vmax.f32 %v2264_v27, 0.0 }
 0x332   : > { %v2344_v33 = vmax.f32 %v2256_v30, 0.0  ;;  %v2370_v36 = vpack.c.bf16 %v2346_v31, %v2345_v34  ;;  %v4078_v30 = vld [vmem:[%s4202_s8] ss:$0 sm:$0xff] }
 0x334   : > { %v2369_v35 = vpack.c.bf16 %v2344_v33, %v2343_v32 }
 0x336   : > { %3213 = vmatprep.mubr.bf16.mxu1 %v2369_v35 }
 0x337   : > { %3214 = vmatmul.mubr.bf16.gmra.mxu1 %v2370_v36 }
 0x339   : > { %v3171_v37 = vpop.f32.mrf.mxu0 }
 0x33a   : > { %v2277_v42 = vadd.f32 %v3171_v37, %v4039_v12 }
 0x33b   : > { %v2268_v38 = vpop.f32.mrf.mxu0 }
 0x33c   : > { %v2269_v40 = vadd.f32 %v4039_v12, %v2268_v38  ;;  %v2349_v46 = vmax.f32 %v2277_v42, 0.0 }
 0x33d   : > { %v3172_v39 = vpop.f32.mrf.mxu0 }
 0x33e   : > { %v2280_v41 = vadd.f32 %v3172_v39, %v4039_v12  ;;  %v2347_v45 = vmax.f32 %v2269_v40, 0.0 }
 0x33f   : > { %v2271_v43 = vpop.f32.mrf.mxu0 }
 0x340   : > { %v2272_v11 = vadd.f32 %v4039_v12, %v2271_v43  ;;  %v2350_v44 = vmax.f32 %v2280_v41, 0.0 }
 0x342   : > { %v2348_v9 = vmax.f32 %v2272_v11, 0.0  ;;  %v2372_v47 = vpack.c.bf16 %v2350_v44, %v2349_v46 }
 0x344   : > { %v2371_v10 = vpack.c.bf16 %v2348_v9, %v2347_v45 }
 0x346   : > { %3217 = vmatprep.mubr.bf16.mxu1 %v2371_v10 }
 0x347   : > { %3218 = vmatmul.mubr.bf16.gmra.mxu1 %v2372_v47 }
 0x349   : > { %v3175_v48 = vpop.f32.mrf.mxu0 }
 0x34a   : > { %v2293_v53 = vadd.f32 %v3175_v48, %v4039_v12 }
 0x34b   : > { %v2284_v49 = vpop.f32.mrf.mxu0 }
 0x34c   : > { %v2285_v51 = vadd.f32 %v4039_v12, %v2284_v49  ;;  %v2353_v59 = vmax.f32 %v2293_v53, 0.0 }
 0x34d   : > { %v3176_v50 = vpop.f32.mrf.mxu0 }
 0x34e   : > { %v2296_v52 = vadd.f32 %v3176_v50, %v4039_v12  ;;  %v2351_v57 = vmax.f32 %v2285_v51, 0.0 }
 0x34f   : > { %v2287_v54 = vpop.f32.mrf.mxu0 }
 0x350   : > { %v2288_v55 = vadd.f32 %v4039_v12, %v2287_v54  ;;  %v2354_v56 = vmax.f32 %v2296_v52, 0.0 }
 0x352   : > { %v2352_v58 = vmax.f32 %v2288_v55, 0.0  ;;  %v2374_v61 = vpack.c.bf16 %v2354_v56, %v2353_v59 }
 0x354   : > { %v2373_v60 = vpack.c.bf16 %v2352_v58, %v2351_v57 }
 0x356   : > { %3221 = vmatprep.mubr.bf16.mxu1 %v2373_v60 }
 0x357   : > { %3222 = vmatmul.mubr.bf16.gmra.mxu1 %v2374_v61 }
 0x359   : > { %v3179_v62 = vpop.f32.mrf.mxu0 }
 0x35a   : > { %v2309_v3 = vadd.f32 %v3179_v62, %v4039_v12 }
 0x35b   : > { %v2300_v63 = vpop.f32.mrf.mxu0 }
 0x35c   : > { %v2301_v1 = vadd.f32 %v4039_v12, %v2300_v63  ;;  %v2357_v13 = vmax.f32 %v2309_v3, 0.0 }
 0x35d   : > { %v3180_v0 = vpop.f32.mrf.mxu0 }
 0x35e   : > { %v2312_v2 = vadd.f32 %v3180_v0, %v4039_v12  ;;  %v2355_v7 = vmax.f32 %v2301_v1, 0.0 }
 0x35f   : > { %v2303_v4 = vpop.f32.mrf.mxu0 }
 0x360   : > { %v2304_v5 = vadd.f32 %v4039_v12, %v2303_v4  ;;  %v2358_v6 = vmax.f32 %v2312_v2, 0.0 }
 0x362   : > { %v2356_v8 = vmax.f32 %v2304_v5, 0.0  ;;  %v2376_v15 = vpack.c.bf16 %v2358_v6, %v2357_v13 }
 0x364   : > { %v2375_v14 = vpack.c.bf16 %v2356_v8, %v2355_v7 }
 0x366   : > { %3225 = vmatprep.mubr.bf16.mxu1 %v2375_v14 }
 0x367   : > { %3226 = vmatmul.mubr.bf16.gmra.mxu1 %v2376_v15 }
 0x369   : > { %v3183_v16 = vpop.f32.mrf.mxu0 }
 0x36a   : > { %v2325_v21 = vadd.f32 %v3183_v16, %v4039_v12 }
 0x36b   : > { %v2316_v17 = vpop.f32.mrf.mxu0 }
 0x36c   : > { %v2317_v19 = vadd.f32 %v4039_v12, %v2316_v17  ;;  %v2361_v27 = vmax.f32 %v2325_v21, 0.0 }
 0x36d   : > { %v3184_v18 = vpop.f32.mrf.mxu0 }
 0x36e   : > { %v2328_v20 = vadd.f32 %v3184_v18, %v4039_v12  ;;  %v2359_v25 = vmax.f32 %v2317_v19, 0.0 }
 0x36f   : > { %v2319_v22 = vpop.f32.mrf.mxu0 }
 0x370   : > { %v2320_v23 = vadd.f32 %v4039_v12, %v2319_v22  ;;  %v2362_v24 = vmax.f32 %v2328_v20, 0.0 }
 0x372   : > { %v2360_v26 = vmax.f32 %v2320_v23, 0.0  ;;  %v2378_v29 = vpack.c.bf16 %v2362_v24, %v2361_v27 }
 0x374   : > { %v2377_v28 = vpack.c.bf16 %v2360_v26, %v2359_v25 }
 0x376   : > { %3229 = vmatprep.mubr.bf16.mxu1 %v2377_v28 }
 0x377   : > { %3230 = vmatmul.mubr.bf16.gmra.mxu1 %v2378_v29 }
 0x3c7   : > { %v3203_v12 = vpop.f32.mrf.mxu1 }
 0x3c8   : > { %v2493_v31 = vadd.f32 %v3203_v12, %v4078_v30 }
 0x3c9   : > { %v2484_v32 = vpop.f32.mrf.mxu1 }
 0x3ca   : > { %2614 = vst.msk [vmem:[%s4083_s24 + $0x10] sm:$0xff] %vm2611_vm0, %v2493_v31  ;;  %v2485_v33 = vadd.f32 %v4078_v30, %v2484_v32 }
 0x3cb   : > { %v3204_v34 = vpop.f32.mrf.mxu1 }
 0x3cc   : > { %2612 = vst.msk [vmem:[%s4083_s24] sm:$0xff] %vm2611_vm0, %v2485_v33  ;;  %v2496_v35 = vadd.f32 %v3204_v34, %v4078_v30 }
 0x3cd   : > { %v2487_v36 = vpop.f32.mrf.mxu1 }
 0x3ce   : > { %2615 = vst.msk [vmem:[%s4083_s24 + $0x18] sm:$0xff] %vm2611_vm0, %v2496_v35  ;;  %v2488_v37 = vadd.f32 %v4078_v30, %v2487_v36 }
 0x3d0   : > { %2613 = vst.msk [vmem:[%s4083_s24 + $0x8] sm:$0xff] %vm2611_vm0, %v2488_v37 }
 0x3d7   : > { %v3207_v38 = vpop.f32.mrf.mxu1 }
 0x3d8   : > { %v2509_v39 = vadd.f32 %v3207_v38, %v4078_v30 }
 0x3d9   : > { %v2500_v40 = vpop.f32.mrf.mxu1 }
 0x3da   : > { %2618 = vst.msk [vmem:[%s4083_s24 + $0x30] sm:$0xff] %vm2611_vm0, %v2509_v39  ;;  %v2501_v41 = vadd.f32 %v4078_v30, %v2500_v40 }
 0x3db   : > { %v3208_v42 = vpop.f32.mrf.mxu1 }
 0x3dc   : > { %2616 = vst.msk [vmem:[%s4083_s24 + $0x20] sm:$0xff] %vm2611_vm0, %v2501_v41  ;;  %v2512_v43 = vadd.f32 %v3208_v42, %v4078_v30 }
 0x3dd   : > { %v2503_v11 = vpop.f32.mrf.mxu1 }
 0x3de   : > { %2619 = vst.msk [vmem:[%s4083_s24 + $0x38] sm:$0xff] %vm2611_vm0, %v2512_v43  ;;  %v2504_v44 = vadd.f32 %v4078_v30, %v2503_v11 }
 0x3e0   : > { %2617 = vst.msk [vmem:[%s4083_s24 + $0x28] sm:$0xff] %vm2611_vm0, %v2504_v44 }
 0x3e7   : > { %v3211_v45 = vpop.f32.mrf.mxu1 }
 0x3e8   : > { %v2525_v9 = vadd.f32 %v3211_v45, %v4078_v30 }
 0x3e9   : > { %v2516_v46 = vpop.f32.mrf.mxu1 }
 0x3ea   : > { %2622 = vst.msk [vmem:[%s4083_s24 + $0x50] sm:$0xff] %vm2611_vm0, %v2525_v9  ;;  %v2517_v10 = vadd.f32 %v4078_v30, %v2516_v46 }
 0x3eb   : > { %v3212_v47 = vpop.f32.mrf.mxu1 }
 0x3ec   : > { %2620 = vst.msk [vmem:[%s4083_s24 + $0x40] sm:$0xff] %vm2611_vm0, %v2517_v10  ;;  %v2528_v48 = vadd.f32 %v3212_v47, %v4078_v30 }
 0x3ed   : > { %v2519_v49 = vpop.f32.mrf.mxu1 }
 0x3ee   : > { %2623 = vst.msk [vmem:[%s4083_s24 + $0x58] sm:$0xff] %vm2611_vm0, %v2528_v48  ;;  %v2520_v50 = vadd.f32 %v4078_v30, %v2519_v49 }
 0x3f0   : > { %2621 = vst.msk [vmem:[%s4083_s24 + $0x48] sm:$0xff] %vm2611_vm0, %v2520_v50 }
 0x3f7   : > { %v3215_v51 = vpop.f32.mrf.mxu1 }
 0x3f8   : > { %v2541_v52 = vadd.f32 %v3215_v51, %v4078_v30 }
 0x3f9   : > { %v2532_v53 = vpop.f32.mrf.mxu1 }
 0x3fa   : > { %2626 = vst.msk [vmem:[%s4083_s24 + $0x70] sm:$0xff] %vm2611_vm0, %v2541_v52  ;;  %v2533_v54 = vadd.f32 %v4078_v30, %v2532_v53 }
 0x3fb   : > { %v3216_v55 = vpop.f32.mrf.mxu1 }
 0x3fc   : > { %2624 = vst.msk [vmem:[%s4083_s24 + $0x60] sm:$0xff] %vm2611_vm0, %v2533_v54  ;;  %v2544_v56 = vadd.f32 %v3216_v55, %v4078_v30 }
 0x3fd   : > { %v2535_v57 = vpop.f32.mrf.mxu1 }
 0x3fe   : > { %2627 = vst.msk [vmem:[%s4083_s24 + $0x78] sm:$0xff] %vm2611_vm0, %v2544_v56  ;;  %v2536_v58 = vadd.f32 %v4078_v30, %v2535_v57 }
 0x400   : > { %2625 = vst.msk [vmem:[%s4083_s24 + $0x68] sm:$0xff] %vm2611_vm0, %v2536_v58 }
 0x407   : > { %v3219_v59 = vpop.f32.mrf.mxu1 }
 0x408   : > { %v2557_v60 = vadd.f32 %v3219_v59, %v4078_v30 }
 0x409   : > { %v2548_v61 = vpop.f32.mrf.mxu1 }
 0x40a   : > { %2630 = vst.msk [vmem:[%s4083_s24 + $0x90] sm:$0xff] %vm2611_vm0, %v2557_v60  ;;  %v2549_v62 = vadd.f32 %v4078_v30, %v2548_v61 }
 0x40b   : > { %v3220_v63 = vpop.f32.mrf.mxu1 }
 0x40c   : > { %2628 = vst.msk [vmem:[%s4083_s24 + $0x80] sm:$0xff] %vm2611_vm0, %v2549_v62  ;;  %v2560_v0 = vadd.f32 %v3220_v63, %v4078_v30 }
 0x40d   : > { %v2551_v1 = vpop.f32.mrf.mxu1 }
 0x40e   : > { %2631 = vst.msk [vmem:[%s4083_s24 + $0x98] sm:$0xff] %vm2611_vm0, %v2560_v0  ;;  %v2552_v2 = vadd.f32 %v4078_v30, %v2551_v1 }
 0x410   : > { %2629 = vst.msk [vmem:[%s4083_s24 + $0x88] sm:$0xff] %vm2611_vm0, %v2552_v2 }
 0x417   : > { %v3223_v3 = vpop.f32.mrf.mxu1 }
 0x418   : > { %v2573_v4 = vadd.f32 %v3223_v3, %v4078_v30 }
 0x419   : > { %v2564_v5 = vpop.f32.mrf.mxu1 }
 0x41a   : > { %2634 = vst.msk [vmem:[%s4083_s24 + $0xb0] sm:$0xff] %vm2611_vm0, %v2573_v4  ;;  %v2565_v6 = vadd.f32 %v4078_v30, %v2564_v5 }
 0x41b   : > { %v3224_v7 = vpop.f32.mrf.mxu1 }
 0x41c   : > { %2632 = vst.msk [vmem:[%s4083_s24 + $0xa0] sm:$0xff] %vm2611_vm0, %v2565_v6  ;;  %v2576_v8 = vadd.f32 %v3224_v7, %v4078_v30 }
 0x41d   : > { %v2567_v13 = vpop.f32.mrf.mxu1 }
 0x41e   : > { %2635 = vst.msk [vmem:[%s4083_s24 + $0xb8] sm:$0xff] %vm2611_vm0, %v2576_v8  ;;  %v2568_v14 = vadd.f32 %v4078_v30, %v2567_v13 }
 0x420   : > { %2633 = vst.msk [vmem:[%s4083_s24 + $0xa8] sm:$0xff] %vm2611_vm0, %v2568_v14 }
 0x427   : > { %v3227_v15 = vpop.f32.mrf.mxu1 }
 0x428   : > { %v2589_v16 = vadd.f32 %v3227_v15, %v4078_v30 }
 0x429   : > { %v2580_v17 = vpop.f32.mrf.mxu1 }
 0x42a   : > { %2638 = vst.msk [vmem:[%s4083_s24 + $0xd0] sm:$0xff] %vm2611_vm0, %v2589_v16  ;;  %v2581_v18 = vadd.f32 %v4078_v30, %v2580_v17 }
 0x42b   : > { %v3228_v19 = vpop.f32.mrf.mxu1 }
 0x42c   : > { %2636 = vst.msk [vmem:[%s4083_s24 + $0xc0] sm:$0xff] %vm2611_vm0, %v2581_v18  ;;  %v2592_v20 = vadd.f32 %v3228_v19, %v4078_v30 }
 0x42d   : > { %v2583_v21 = vpop.f32.mrf.mxu1 }
 0x42e   : > { %2639 = vst.msk [vmem:[%s4083_s24 + $0xd8] sm:$0xff] %vm2611_vm0, %v2592_v20  ;;  %v2584_v22 = vadd.f32 %v4078_v30, %v2583_v21 }
 0x430   : > { %2637 = vst.msk [vmem:[%s4083_s24 + $0xc8] sm:$0xff] %vm2611_vm0, %v2584_v22 }
 0x437   : > { %v3231_v23 = vpop.f32.mrf.mxu1 }
 0x438   : > { %v2605_v24 = vadd.f32 %v3231_v23, %v4078_v30 }
 0x439   : > { %v2596_v25 = vpop.f32.mrf.mxu1 }
 0x43a   : > { %2642 = vst.msk [vmem:[%s4083_s24 + $0xf0] sm:$0xff] %vm2611_vm0, %v2605_v24  ;;  %v2597_v26 = vadd.f32 %v4078_v30, %v2596_v25 }
 0x43b   : > { %v3232_v27 = vpop.f32.mrf.mxu1 }
 0x43c   : > { %2640 = vst.msk [vmem:[%s4083_s24 + $0xe0] sm:$0xff] %vm2611_vm0, %v2597_v26  ;;  %v2608_v28 = vadd.f32 %v3232_v27, %v4078_v30 }
 0x43d   : > { %v2599_v29 = vpop.f32.mrf.mxu1 }
 0x43e   : > { %2643 = vst.msk [vmem:[%s4083_s24 + $0xf8] sm:$0xff] %vm2611_vm0, %v2608_v28  ;;  %v2600_v12 = vadd.f32 %v4078_v30, %v2599_v29 }
 0x440   : > { %2641 = vst.msk [vmem:[%s4083_s24 + $0xe8] sm:$0xff] %vm2611_vm0, %v2600_v12 }
 0x441 PF: > { %p20_p7 = scmp.ge.s32.totalorder %s3686_s18, 4   ;;  %s4222_s30 = smov %s3551_s10 }
 0x442   : > { %s4223_s10 = smov %s3555_s11  ;;  %s4224_s11 = smov %s3695_s25 }
 0x443   : > { %s4225_s12 = smov %s3686_s18  ;;  %22 = sbr.rel (!%p20_p7) target bundleno = 4 (0x4), region = 104 }
 0x448   :  { %2666 = vsyncpa [#allocation3], 1 }
 0x449   :  { %2668 = vsyncpa [#allocation3 + $0x1], 1 }
 0x44a   :  { %2669 = vsyncpa [#allocation5], 1 }

</bundles_post_ra>
